<compile_context>
chip_gen: v6e
topology: v6e:2x2x1
jax: 0.10.0
libtpu: 0.0.40
codegen_flags: <defaults>
</compile_context>

<pallas_src>
import math

import jax
import jax.numpy as jnp
from jax.experimental import pallas as pl
from jax.experimental.pallas import tpu as pltpu

# ---- config (mirrors __C of the PyTorch module, at small sizes) ----
HIDDEN_SIZE = 32
FF_SIZE = 128
MULTI_HEAD = 4
HIDDEN_SIZE_HEAD = HIDDEN_SIZE // MULTI_HEAD
LN_EPS = 1e-6

# ---- packed-slab column offsets (static, used inside the kernel) ----
_H = HIDDEN_SIZE
# W slab: [wq1 | wk1 | wv1 | wm1 | wq2 | wk2 | wv2 | wm2 | wf1]
WO_QKV1 = 0 * _H          # (H, 3H) fused self-attn q/k/v
WO_WM1 = 3 * _H           # (H, H)
WO_Q2 = 4 * _H            # (H, H)
WO_KV2 = 5 * _H           # (H, 2H)
WO_WM2 = 7 * _H           # (H, H)
WO_F1 = 8 * _H            # (H, FF)
W_COLS = 8 * _H + FF_SIZE
# V slab: [bq1|bk1|bv1|bm1|g1|be1|bq2|bk2|bv2|bm2|g2|be2|bf1|bf2|g3|be3]
VO_QKV1 = 0 * _H
VO_BM1 = 3 * _H
VO_G1 = 4 * _H
VO_B1 = 5 * _H
VO_Q2 = 6 * _H
VO_KV2 = 7 * _H
VO_BM2 = 9 * _H
VO_G2 = 10 * _H
VO_B2 = 11 * _H
VO_F1 = 12 * _H
VO_F2 = 12 * _H + FF_SIZE
VO_G3 = VO_F2 + _H
VO_B3 = VO_G3 + _H
V_COLS = VO_B3 + _H


# ----------------------------- in-kernel helpers -----------------------------

def _add_layernorm(x, r, g, b):
    # MCAN LayerNorm: a_2 * (h - mean) / (std_unbiased + eps) + b_2   on h = x + r
    h = x + r
    n = h.shape[-1]
    mean = jnp.mean(h, axis=-1, keepdims=True)
    d = h - mean
    var_unbiased = jnp.sum(d * d, axis=-1, keepdims=True) * (1.0 / (n - 1))
    std = jnp.sqrt(var_unbiased)
    # exact divide: approx reciprocal error compounds through 3 stacked norms.
    return g * d / (std + LN_EPS) + b


def _mhatt(q2, k2, v2, bias, wm, bm, bt, sq, skv, want_map):
    """q2: (Bt*Sq, H), k2/v2: (Bt*Skv, H), bias: (Bt, 1, Skv) 0/1 * (-1e9).

    Returns atted (Bt*Sq, H) and, if want_map, the lane-dense attention map
    (Bt, Sq, MULTI_HEAD*Skv)."""
    h_sz = HIDDEN_SIZE
    dh = HIDDEN_SIZE_HEAD
    q3 = q2.reshape(bt, sq, h_sz)
    k3 = k2.reshape(bt, skv, h_sz)
    v3 = v2.reshape(bt, skv, h_sz)

    scale = 1.0 / math.sqrt(dh)
    # per-head scores stacked on a LEADING axis (layout-friendly), single softmax.
    s = jnp.stack(
        [jnp.einsum('bqd,bkd->bqk',
                    q3[:, :, h * dh:(h + 1) * dh], k3[:, :, h * dh:(h + 1) * dh],
                    preferred_element_type=jnp.float32)
         for h in range(MULTI_HEAD)],
        axis=0)                                           # (MH, Bt, Sq, Skv)
    s = s * scale + bias[None, :, :, :]
    s = s - jnp.max(s, axis=-1, keepdims=True)
    e = jnp.exp(s)
    p = e * pl.reciprocal(jnp.sum(e, axis=-1, keepdims=True), approx=True)

    # PV + merge: sum of per-head matmuls (no lane-axis concatenate of heads).
    atted = None
    for h in range(MULTI_HEAD):
        oh = jnp.einsum('bqk,bkd->bqd', p[h], v3[:, :, h * dh:(h + 1) * dh],
                        preferred_element_type=jnp.float32)           # (Bt, Sq, Dh)
        part = jnp.dot(oh.reshape(bt * sq, dh), wm[h * dh:(h + 1) * dh, :],
                       preferred_element_type=jnp.float32)            # (Bt*Sq, H)
        atted = part if atted is None else atted + part
    atted = atted + bm

    amap = None
    if want_map:
        # heads contiguous along the last axis -> one dense store per grid step
        amap = jnp.concatenate([p[h] for h in range(MULTI_HEAD)], axis=-1)
    return atted, amap


# ----------------------------- fused SGA kernel -----------------------------

def _sga_kernel(x_ref, y_ref, xm_ref, ym_ref, w_ref, wf2_ref, v_ref,
                out_ref, amap_ref):
    bt, sx, h_sz = x_ref.shape
    sy = y_ref.shape[1]

    # residual stream kept flattened (Bt*Sx, H) so matmul M = Bt*Sx
    x2 = x_ref[...].reshape(bt * sx, h_sz)
    y2 = y_ref[...].reshape(bt * sy, h_sz)
    # mask -> additive (-1e9) bias computed in-kernel (free VPU work)
    xbias = xm_ref[...] * jnp.float32(-1e9)     # (Bt, 1, Sx)
    ybias = ym_ref[...] * jnp.float32(-1e9)     # (Bt, 1, Sy)

    # ---- 1) self-attention (fused q/k/v projection) + add & norm1 ----
    qkv = (jnp.dot(x2, w_ref[:, WO_QKV1:WO_QKV1 + 3 * h_sz],
                   preferred_element_type=jnp.float32)
           + v_ref[:, VO_QKV1:VO_QKV1 + 3 * h_sz])
    att1, _ = _mhatt(qkv[:, 0:h_sz], qkv[:, h_sz:2 * h_sz], qkv[:, 2 * h_sz:3 * h_sz],
                     xbias,
                     w_ref[:, WO_WM1:WO_WM1 + h_sz], v_ref[:, VO_BM1:VO_BM1 + h_sz],
                     bt, sx, sx, want_map=False)
    x2 = _add_layernorm(x2, att1,
                        v_ref[:, VO_G1:VO_G1 + h_sz], v_ref[:, VO_B1:VO_B1 + h_sz])

    # ---- 2) cross-attention: q from x, k/v from y; + add & norm2 ----
    q2 = (jnp.dot(x2, w_ref[:, WO_Q2:WO_Q2 + h_sz], preferred_element_type=jnp.float32)
          + v_ref[:, VO_Q2:VO_Q2 + h_sz])
    kv2 = (jnp.dot(y2, w_ref[:, WO_KV2:WO_KV2 + 2 * h_sz],
                   preferred_element_type=jnp.float32)
           + v_ref[:, VO_KV2:VO_KV2 + 2 * h_sz])
    att2, amap = _mhatt(q2, kv2[:, 0:h_sz], kv2[:, h_sz:2 * h_sz],
                        ybias,
                        w_ref[:, WO_WM2:WO_WM2 + h_sz], v_ref[:, VO_BM2:VO_BM2 + h_sz],
                        bt, sx, sy, want_map=True)
    amap_ref[...] = amap                               # single lane-dense store
    x2 = _add_layernorm(x2, att2,
                        v_ref[:, VO_G2:VO_G2 + h_sz], v_ref[:, VO_B2:VO_B2 + h_sz])

    # ---- 3) FFN + add & norm3 ----
    hmid = (jnp.dot(x2, w_ref[:, WO_F1:WO_F1 + FF_SIZE],
                    preferred_element_type=jnp.float32)
            + v_ref[:, VO_F1:VO_F1 + FF_SIZE])
    hmid = jnp.maximum(hmid, 0.0)                      # ReLU
    f = (jnp.dot(hmid, wf2_ref[...], preferred_element_type=jnp.float32)
         + v_ref[:, VO_F2:VO_F2 + h_sz])
    x2 = _add_layernorm(x2, f,
                        v_ref[:, VO_G3:VO_G3 + h_sz], v_ref[:, VO_B3:VO_B3 + h_sz])
    out_ref[...] = x2.reshape(bt, sx, h_sz)


# ----------------------------- wrapper -----------------------------

def _pick_batch_block(batch):
    """Largest divisor of batch that keeps >= 2 grid steps (both v7x TCs busy)."""
    if batch < 2:
        return batch
    return max(d for d in range(1, batch) if batch % d == 0 and batch // d >= 2)


def _pack_params(params):
    p1, p2, pf = params["mhatt1"], params["mhatt2"], params["ffn"]
    n1, n2, n3 = params["norm1"], params["norm2"], params["norm3"]
    w_slab = jnp.concatenate(
        [p1["wq"], p1["wkv"], p1["wm"],
         p2["wq"], p2["wkv"], p2["wm"],
         pf["w1"]], axis=1)                                     # (H, 8H + FF)
    v_slab = jnp.concatenate(
        [p1["bq"], p1["bkv"], p1["bm"], n1["g"], n1["b"],
         p2["bq"], p2["bkv"], p2["bm"], n2["g"], n2["b"],
         pf["b1"], pf["b2"], n3["g"], n3["b"]], axis=1)         # (1, 12H + FF + 3H)
    assert w_slab.shape == (HIDDEN_SIZE, W_COLS)
    assert v_slab.shape == (1, V_COLS)
    return w_slab, pf["w2"], v_slab


def sga_forward(params, x, y, x_mask, y_mask):
    """x: (B, Sx, H); y: (B, Sy, H); masks: (B,1,1,S) bool, True == padded."""
    B, Sx, H = x.shape
    Sy = y.shape[1]
    assert H == HIDDEN_SIZE

    Bt = _pick_batch_block(B)
    n_steps = B // Bt

    # masks passed as 0/1 f32; the (-1e9) scaling happens inside the kernel.
    xm = x_mask.reshape(B, 1, Sx).astype(jnp.float32)
    ym = y_mask.reshape(B, 1, Sy).astype(jnp.float32)

    w_slab, wf2, v_slab = _pack_params(params)

    def batched(shape):
        blk = (Bt,) + tuple(shape[1:])
        nd = len(shape)
        return pl.BlockSpec(blk, lambda b, nd=nd: (b,) + (0,) * (nd - 1))

    def replicated(arr):
        nd = arr.ndim
        # constant index_map: Mosaic only DMAs this block once across grid steps.
        return pl.BlockSpec(arr.shape, lambda b, nd=nd: (0,) * nd)

    out, amap = pl.pallas_call(
        _sga_kernel,
        grid=(n_steps,),
        out_shape=(
            jax.ShapeDtypeStruct((B, Sx, HIDDEN_SIZE), jnp.float32),
            jax.ShapeDtypeStruct((B, Sx, MULTI_HEAD * Sy), jnp.float32),
        ),
        in_specs=[
            batched(x.shape), batched(y.shape), batched(xm.shape), batched(ym.shape),
            replicated(w_slab), replicated(wf2), replicated(v_slab),
        ],
        out_specs=(
            pl.BlockSpec((Bt, Sx, HIDDEN_SIZE), lambda b: (b, 0, 0)),
            pl.BlockSpec((Bt, Sx, MULTI_HEAD * Sy), lambda b: (b, 0, 0)),
        ),
        compiler_params=pltpu.CompilerParams(
            dimension_semantics=("parallel",),
        ),
    )(x, y, xm, ym, w_slab, wf2, v_slab)

    # reference layout for the attention map: (B, MULTI_HEAD, Sx, Sy)
    amap = amap.reshape(B, Sx, MULTI_HEAD, Sy).transpose(0, 2, 1, 3)
    return out, amap


# ----------------------------- deterministic init -----------------------------

def _linear_init(key, fan_in, fan_out):
    kw, kb = jax.random.split(key)
    bound = 1.0 / math.sqrt(fan_in)
    w = jax.random.uniform(kw, (fan_in, fan_out), jnp.float32, -bound, bound)
    b = jax.random.uniform(kb, (fan_out,), jnp.float32, -bound, bound)
    return w, b


def _mhatt_init(key):
    kv, kk, kq, km = jax.random.split(key, 4)
    wv, bv = _linear_init(kv, HIDDEN_SIZE, HIDDEN_SIZE)
    wk, bk = _linear_init(kk, HIDDEN_SIZE, HIDDEN_SIZE)
    wq, bq = _linear_init(kq, HIDDEN_SIZE, HIDDEN_SIZE)
    wm, bm = _linear_init(km, HIDDEN_SIZE, HIDDEN_SIZE)
    return dict(
        wq=wq, bq=bq.reshape(1, -1),
        wkv=jnp.concatenate([wk, wv], axis=1),          # fused k/v projection
        bkv=jnp.concatenate([bk, bv]).reshape(1, -1),
        wm=wm, bm=bm.reshape(1, -1),
    )


def init_params(key):
    k1, k2, kf1, kf2 = jax.random.split(key, 4)
    w1, b1 = _linear_init(kf1, HIDDEN_SIZE, FF_SIZE)
    w2, b2 = _linear_init(kf2, FF_SIZE, HIDDEN_SIZE)
    ln = lambda: dict(g=jnp.ones((1, HIDDEN_SIZE), jnp.float32),
                      b=jnp.zeros((1, HIDDEN_SIZE), jnp.float32))
    return dict(
        mhatt1=_mhatt_init(k1),
        mhatt2=_mhatt_init(k2),
        ffn=dict(w1=w1, b1=b1.reshape(1, -1), w2=w2, b2=b2.reshape(1, -1)),
        norm1=ln(), norm2=ln(), norm3=ln(),
    )


# ----------------------------- main -----------------------------

if __name__ == "__main__":
    key = jax.random.PRNGKey(0)
    kx, ky, kp = jax.random.split(key, 3)

    B, Sx, Sy = 2, 8, 16
    x = jax.random.normal(kx, (B, Sx, HIDDEN_SIZE), jnp.float32)
    y = jax.random.normal(ky, (B, Sy, HIDDEN_SIZE), jnp.float32)

    # masks: True == padded position (masked out), same convention as masked_fill
    x_len = jnp.array([8, 6])
    y_len = jnp.array([16, 11])
    x_mask = (jnp.arange(Sx)[None, :] >= x_len[:, None]).reshape(B, 1, 1, Sx)
    y_mask = (jnp.arange(Sy)[None, :] >= y_len[:, None]).reshape(B, 1, 1, Sy)

    params = init_params(kp)

    fwd = jax.jit(sga_forward)
    out, att_map = fwd(params, x, y, x_mask, y_mask)
    jax.block_until_ready((out, att_map))

    assert out.shape == (B, Sx, HIDDEN_SIZE)
    assert att_map.shape == (B, MULTI_HEAD, Sx, Sy)
    assert bool(jnp.all(jnp.isfinite(out))) and bool(jnp.all(jnp.isfinite(att_map)))
    print("KERNEL_OK")
</pallas_src>

<mosaic_0001>
module attributes {stable_mosaic.version = 11 : i64} {
  func.func @_sga_kernel(%arg0: i32, %arg1: memref<1x8x32xf32, #tpu.memory_space<vmem>>, %arg2: memref<1x16x32xf32, #tpu.memory_space<vmem>>, %arg3: memref<1x1x8xf32, #tpu.memory_space<vmem>>, %arg4: memref<1x1x16xf32, #tpu.memory_space<vmem>>, %arg5: memref<32x384xf32, #tpu.memory_space<vmem>>, %arg6: memref<128x32xf32, #tpu.memory_space<vmem>>, %arg7: memref<1x608xf32, #tpu.memory_space<vmem>>, %arg8: memref<1x8x32xf32, #tpu.memory_space<vmem>>, %arg9: memref<1x8x64xf32, #tpu.memory_space<vmem>>) attributes {dimension_semantics = [#tpu.dimension_semantics<parallel>], iteration_bounds = array<i64: 2>, scalar_prefetch = 0 : i64, scratch_operands = 0 : i64, tpu.core_type = #tpu.core_type<tc>, window_params = [{transform_indices = @transform_0, window_bounds = array<i64: 1, 8, 32>}, {transform_indices = @transform_1, window_bounds = array<i64: 1, 16, 32>}, {transform_indices = @transform_2, window_bounds = array<i64: 1, 1, 8>}, {transform_indices = @transform_3, window_bounds = array<i64: 1, 1, 16>}, {pipeline_mode = #tpu.pipeline_mode<synchronous>, transform_indices = @transform_4, window_bounds = array<i64: 32, 384>}, {pipeline_mode = #tpu.pipeline_mode<synchronous>, transform_indices = @transform_5, window_bounds = array<i64: 128, 32>}, {pipeline_mode = #tpu.pipeline_mode<synchronous>, transform_indices = @transform_6, window_bounds = array<i64: 1, 608>}, {transform_indices = @transform_7, window_bounds = array<i64: 1, 8, 32>}, {transform_indices = @transform_8, window_bounds = array<i64: 1, 8, 64>}]} {
    %c0 = arith.constant 0 : index
    %c0_0 = arith.constant 0 : index
    %c0_1 = arith.constant 0 : index
    %0 = vector.load %arg1[%c0, %c0_0, %c0_1] : memref<1x8x32xf32, #tpu.memory_space<vmem>>, vector<1x8x32xf32>
    %1 = vector.shape_cast %0 : vector<1x8x32xf32> to vector<8x32xf32>
    %c0_2 = arith.constant 0 : index
    %c0_3 = arith.constant 0 : index
    %c0_4 = arith.constant 0 : index
    %2 = vector.load %arg2[%c0_2, %c0_3, %c0_4] : memref<1x16x32xf32, #tpu.memory_space<vmem>>, vector<1x16x32xf32>
    %3 = vector.shape_cast %2 : vector<1x16x32xf32> to vector<16x32xf32>
    %c0_5 = arith.constant 0 : index
    %c0_6 = arith.constant 0 : index
    %c0_7 = arith.constant 0 : index
    %4 = vector.load %arg3[%c0_5, %c0_6, %c0_7] : memref<1x1x8xf32, #tpu.memory_space<vmem>>, vector<1x1x8xf32>
    %cst = arith.constant -1.000000e+09 : f32
    %5 = vector.broadcast %cst : f32 to vector<1x1x8xf32>
    %6 = arith.mulf %4, %5 : vector<1x1x8xf32>
    %c0_8 = arith.constant 0 : index
    %c0_9 = arith.constant 0 : index
    %c0_10 = arith.constant 0 : index
    %7 = vector.load %arg4[%c0_8, %c0_9, %c0_10] : memref<1x1x16xf32, #tpu.memory_space<vmem>>, vector<1x1x16xf32>
    %cst_11 = arith.constant -1.000000e+09 : f32
    %8 = vector.broadcast %cst_11 : f32 to vector<1x1x16xf32>
    %9 = arith.mulf %7, %8 : vector<1x1x16xf32>
    %c0_12 = arith.constant 0 : index
    %c0_13 = arith.constant 0 : index
    %10 = vector.load %arg5[%c0_12, %c0_13] : memref<32x384xf32, #tpu.memory_space<vmem>>, vector<32x96xf32>
    %cst_14 = arith.constant dense<0.000000e+00> : vector<8x96xf32>
    %11 = tpu.matmul %1, %10, %cst_14 {dimension_numbers = #tpu.dot_dimension_numbers<[1], [0], [0], [1], [0, 0, 1, 1], [], []>} : vector<8x32xf32>, vector<32x96xf32>, vector<8x96xf32> -> vector<8x96xf32>
    %c0_15 = arith.constant 0 : index
    %c0_16 = arith.constant 0 : index
    %12 = vector.load %arg7[%c0_15, %c0_16] : memref<1x608xf32, #tpu.memory_space<vmem>>, vector<1x96xf32>
    %13 = vector.broadcast %12 : vector<1x96xf32> to vector<8x96xf32>
    %14 = arith.addf %11, %13 : vector<8x96xf32>
    %15 = vector.extract_strided_slice %14 {offsets = [0, 0], sizes = [8, 32], strides = [1, 1]} : vector<8x96xf32> to vector<8x32xf32>
    %16 = vector.extract_strided_slice %14 {offsets = [0, 32], sizes = [8, 32], strides = [1, 1]} : vector<8x96xf32> to vector<8x32xf32>
    %17 = vector.extract_strided_slice %14 {offsets = [0, 64], sizes = [8, 32], strides = [1, 1]} : vector<8x96xf32> to vector<8x32xf32>
    %c0_17 = arith.constant 0 : index
    %c96 = arith.constant 96 : index
    %18 = vector.load %arg5[%c0_17, %c96] : memref<32x384xf32, #tpu.memory_space<vmem>>, vector<32x32xf32>
    %c0_18 = arith.constant 0 : index
    %c96_19 = arith.constant 96 : index
    %19 = vector.load %arg7[%c0_18, %c96_19] : memref<1x608xf32, #tpu.memory_space<vmem>>, vector<1x32xf32>
    %20 = vector.shape_cast %15 : vector<8x32xf32> to vector<1x8x32xf32>
    %21 = vector.shape_cast %16 : vector<8x32xf32> to vector<1x8x32xf32>
    %22 = vector.shape_cast %17 : vector<8x32xf32> to vector<1x8x32xf32>
    %23 = vector.extract_strided_slice %20 {offsets = [0, 0, 0], sizes = [1, 8, 8], strides = [1, 1, 1]} : vector<1x8x32xf32> to vector<1x8x8xf32>
    %24 = vector.extract_strided_slice %21 {offsets = [0, 0, 0], sizes = [1, 8, 8], strides = [1, 1, 1]} : vector<1x8x32xf32> to vector<1x8x8xf32>
    "tpu.trace_start"() <{level = 10 : i32, message = "bqd,bkd->bqk"}> : () -> ()
    %cst_20 = arith.constant dense<0.000000e+00> : vector<1x8x8xf32>
    %25 = tpu.matmul %23, %24, %cst_20 {dimension_numbers = #tpu.dot_dimension_numbers<[2], [2], [1], [1], [0, 0, 0, 1, 1, 1], [0], [0]>} : vector<1x8x8xf32>, vector<1x8x8xf32>, vector<1x8x8xf32> -> vector<1x8x8xf32>
    "tpu.trace_stop"() : () -> ()
    %26 = vector.extract_strided_slice %20 {offsets = [0, 0, 8], sizes = [1, 8, 8], strides = [1, 1, 1]} : vector<1x8x32xf32> to vector<1x8x8xf32>
    %27 = vector.extract_strided_slice %21 {offsets = [0, 0, 8], sizes = [1, 8, 8], strides = [1, 1, 1]} : vector<1x8x32xf32> to vector<1x8x8xf32>
    "tpu.trace_start"() <{level = 10 : i32, message = "bqd,bkd->bqk"}> : () -> ()
    %cst_21 = arith.constant dense<0.000000e+00> : vector<1x8x8xf32>
    %28 = tpu.matmul %26, %27, %cst_21 {dimension_numbers = #tpu.dot_dimension_numbers<[2], [2], [1], [1], [0, 0, 0, 1, 1, 1], [0], [0]>} : vector<1x8x8xf32>, vector<1x8x8xf32>, vector<1x8x8xf32> -> vector<1x8x8xf32>
    "tpu.trace_stop"() : () -> ()
    %29 = vector.extract_strided_slice %20 {offsets = [0, 0, 16], sizes = [1, 8, 8], strides = [1, 1, 1]} : vector<1x8x32xf32> to vector<1x8x8xf32>
    %30 = vector.extract_strided_slice %21 {offsets = [0, 0, 16], sizes = [1, 8, 8], strides = [1, 1, 1]} : vector<1x8x32xf32> to vector<1x8x8xf32>
    "tpu.trace_start"() <{level = 10 : i32, message = "bqd,bkd->bqk"}> : () -> ()
    %cst_22 = arith.constant dense<0.000000e+00> : vector<1x8x8xf32>
    %31 = tpu.matmul %29, %30, %cst_22 {dimension_numbers = #tpu.dot_dimension_numbers<[2], [2], [1], [1], [0, 0, 0, 1, 1, 1], [0], [0]>} : vector<1x8x8xf32>, vector<1x8x8xf32>, vector<1x8x8xf32> -> vector<1x8x8xf32>
    "tpu.trace_stop"() : () -> ()
    %32 = vector.extract_strided_slice %20 {offsets = [0, 0, 24], sizes = [1, 8, 8], strides = [1, 1, 1]} : vector<1x8x32xf32> to vector<1x8x8xf32>
    %33 = vector.extract_strided_slice %21 {offsets = [0, 0, 24], sizes = [1, 8, 8], strides = [1, 1, 1]} : vector<1x8x32xf32> to vector<1x8x8xf32>
    "tpu.trace_start"() <{level = 10 : i32, message = "bqd,bkd->bqk"}> : () -> ()
    %cst_23 = arith.constant dense<0.000000e+00> : vector<1x8x8xf32>
    %34 = tpu.matmul %32, %33, %cst_23 {dimension_numbers = #tpu.dot_dimension_numbers<[2], [2], [1], [1], [0, 0, 0, 1, 1, 1], [0], [0]>} : vector<1x8x8xf32>, vector<1x8x8xf32>, vector<1x8x8xf32> -> vector<1x8x8xf32>
    "tpu.trace_stop"() : () -> ()
    %35 = vector.shape_cast %25 : vector<1x8x8xf32> to vector<1x1x8x8xf32>
    %36 = vector.shape_cast %28 : vector<1x8x8xf32> to vector<1x1x8x8xf32>
    %37 = vector.shape_cast %31 : vector<1x8x8xf32> to vector<1x1x8x8xf32>
    %38 = vector.shape_cast %34 : vector<1x8x8xf32> to vector<1x1x8x8xf32>
    %39 = tpu.concatenate %35, %36, %37, %38 in 0 : vector<1x1x8x8xf32>, vector<1x1x8x8xf32>, vector<1x1x8x8xf32>, vector<1x1x8x8xf32> -> vector<4x1x8x8xf32>
    %cst_24 = arith.constant 0.353553385 : f32
    %40 = vector.broadcast %cst_24 : f32 to vector<4x1x8x8xf32>
    %41 = arith.mulf %39, %40 : vector<4x1x8x8xf32>
    %42 = vector.shape_cast %6 : vector<1x1x8xf32> to vector<1x1x1x8xf32>
    %43 = vector.broadcast %42 : vector<1x1x1x8xf32> to vector<4x1x8x8xf32>
    %44 = arith.addf %41, %43 : vector<4x1x8x8xf32>
    %cst_25 = arith.constant dense<0xFF800000> : vector<4x1x8xf32>
    %45 = vector.multi_reduction <maximumf>, %44, %cst_25 [3] : vector<4x1x8x8xf32> to vector<4x1x8xf32>
    %46 = vector.shape_cast %45 : vector<4x1x8xf32> to vector<4x1x8x1xf32>
    %47 = vector.broadcast %46 : vector<4x1x8x1xf32> to vector<4x1x8x8xf32>
    %48 = arith.subf %44, %47 : vector<4x1x8x8xf32>
    %49 = math.exp %48 : vector<4x1x8x8xf32>
    %cst_26 = arith.constant dense<0.000000e+00> : vector<4x1x8xf32>
    %50 = vector.multi_reduction <add>, %49, %cst_26 [3] : vector<4x1x8x8xf32> to vector<4x1x8xf32>
    %51 = vector.shape_cast %50 : vector<4x1x8xf32> to vector<4x1x8x1xf32>
    %52 = tpu.reciprocal %51 {approx = true} : vector<4x1x8x1xf32> -> vector<4x1x8x1xf32>
    %53 = vector.broadcast %52 : vector<4x1x8x1xf32> to vector<4x1x8x8xf32>
    %54 = arith.mulf %49, %53 : vector<4x1x8x8xf32>
    %55 = vector.extract_strided_slice %54 {offsets = [0, 0, 0, 0], sizes = [1, 1, 8, 8], strides = [1, 1, 1, 1]} : vector<4x1x8x8xf32> to vector<1x1x8x8xf32>
    %56 = vector.shape_cast %55 : vector<1x1x8x8xf32> to vector<1x8x8xf32>
    %57 = vector.extract_strided_slice %22 {offsets = [0, 0, 0], sizes = [1, 8, 8], strides = [1, 1, 1]} : vector<1x8x32xf32> to vector<1x8x8xf32>
    "tpu.trace_start"() <{level = 10 : i32, message = "bqk,bkd->bqd"}> : () -> ()
    %cst_27 = arith.constant dense<0.000000e+00> : vector<1x8x8xf32>
    %58 = tpu.matmul %56, %57, %cst_27 {dimension_numbers = #tpu.dot_dimension_numbers<[2], [1], [1], [2], [0, 0, 0, 1, 1, 2], [0], [0]>} : vector<1x8x8xf32>, vector<1x8x8xf32>, vector<1x8x8xf32> -> vector<1x8x8xf32>
    "tpu.trace_stop"() : () -> ()
    %59 = vector.shape_cast %58 : vector<1x8x8xf32> to vector<8x8xf32>
    %60 = vector.extract_strided_slice %18 {offsets = [0, 0], sizes = [8, 32], strides = [1, 1]} : vector<32x32xf32> to vector<8x32xf32>
    %cst_28 = arith.constant dense<0.000000e+00> : vector<8x32xf32>
    %61 = tpu.matmul %59, %60, %cst_28 {dimension_numbers = #tpu.dot_dimension_numbers<[1], [0], [0], [1], [0, 0, 1, 1], [], []>} : vector<8x8xf32>, vector<8x32xf32>, vector<8x32xf32> -> vector<8x32xf32>
    %62 = vector.extract_strided_slice %54 {offsets = [1, 0, 0, 0], sizes = [1, 1, 8, 8], strides = [1, 1, 1, 1]} : vector<4x1x8x8xf32> to vector<1x1x8x8xf32>
    %63 = vector.shape_cast %62 : vector<1x1x8x8xf32> to vector<1x8x8xf32>
    %64 = vector.extract_strided_slice %22 {offsets = [0, 0, 8], sizes = [1, 8, 8], strides = [1, 1, 1]} : vector<1x8x32xf32> to vector<1x8x8xf32>
    "tpu.trace_start"() <{level = 10 : i32, message = "bqk,bkd->bqd"}> : () -> ()
    %cst_29 = arith.constant dense<0.000000e+00> : vector<1x8x8xf32>
    %65 = tpu.matmul %63, %64, %cst_29 {dimension_numbers = #tpu.dot_dimension_numbers<[2], [1], [1], [2], [0, 0, 0, 1, 1, 2], [0], [0]>} : vector<1x8x8xf32>, vector<1x8x8xf32>, vector<1x8x8xf32> -> vector<1x8x8xf32>
    "tpu.trace_stop"() : () -> ()
    %66 = vector.shape_cast %65 : vector<1x8x8xf32> to vector<8x8xf32>
    %67 = vector.extract_strided_slice %18 {offsets = [8, 0], sizes = [8, 32], strides = [1, 1]} : vector<32x32xf32> to vector<8x32xf32>
    %cst_30 = arith.constant dense<0.000000e+00> : vector<8x32xf32>
    %68 = tpu.matmul %66, %67, %cst_30 {dimension_numbers = #tpu.dot_dimension_numbers<[1], [0], [0], [1], [0, 0, 1, 1], [], []>} : vector<8x8xf32>, vector<8x32xf32>, vector<8x32xf32> -> vector<8x32xf32>
    %69 = arith.addf %61, %68 : vector<8x32xf32>
    %70 = vector.extract_strided_slice %54 {offsets = [2, 0, 0, 0], sizes = [1, 1, 8, 8], strides = [1, 1, 1, 1]} : vector<4x1x8x8xf32> to vector<1x1x8x8xf32>
    %71 = vector.shape_cast %70 : vector<1x1x8x8xf32> to vector<1x8x8xf32>
    %72 = vector.extract_strided_slice %22 {offsets = [0, 0, 16], sizes = [1, 8, 8], strides = [1, 1, 1]} : vector<1x8x32xf32> to vector<1x8x8xf32>
    "tpu.trace_start"() <{level = 10 : i32, message = "bqk,bkd->bqd"}> : () -> ()
    %cst_31 = arith.constant dense<0.000000e+00> : vector<1x8x8xf32>
    %73 = tpu.matmul %71, %72, %cst_31 {dimension_numbers = #tpu.dot_dimension_numbers<[2], [1], [1], [2], [0, 0, 0, 1, 1, 2], [0], [0]>} : vector<1x8x8xf32>, vector<1x8x8xf32>, vector<1x8x8xf32> -> vector<1x8x8xf32>
    "tpu.trace_stop"() : () -> ()
    %74 = vector.shape_cast %73 : vector<1x8x8xf32> to vector<8x8xf32>
    %75 = vector.extract_strided_slice %18 {offsets = [16, 0], sizes = [8, 32], strides = [1, 1]} : vector<32x32xf32> to vector<8x32xf32>
    %cst_32 = arith.constant dense<0.000000e+00> : vector<8x32xf32>
    %76 = tpu.matmul %74, %75, %cst_32 {dimension_numbers = #tpu.dot_dimension_numbers<[1], [0], [0], [1], [0, 0, 1, 1], [], []>} : vector<8x8xf32>, vector<8x32xf32>, vector<8x32xf32> -> vector<8x32xf32>
    %77 = arith.addf %69, %76 : vector<8x32xf32>
    %78 = vector.extract_strided_slice %54 {offsets = [3, 0, 0, 0], sizes = [1, 1, 8, 8], strides = [1, 1, 1, 1]} : vector<4x1x8x8xf32> to vector<1x1x8x8xf32>
    %79 = vector.shape_cast %78 : vector<1x1x8x8xf32> to vector<1x8x8xf32>
    %80 = vector.extract_strided_slice %22 {offsets = [0, 0, 24], sizes = [1, 8, 8], strides = [1, 1, 1]} : vector<1x8x32xf32> to vector<1x8x8xf32>
    "tpu.trace_start"() <{level = 10 : i32, message = "bqk,bkd->bqd"}> : () -> ()
    %cst_33 = arith.constant dense<0.000000e+00> : vector<1x8x8xf32>
    %81 = tpu.matmul %79, %80, %cst_33 {dimension_numbers = #tpu.dot_dimension_numbers<[2], [1], [1], [2], [0, 0, 0, 1, 1, 2], [0], [0]>} : vector<1x8x8xf32>, vector<1x8x8xf32>, vector<1x8x8xf32> -> vector<1x8x8xf32>
    "tpu.trace_stop"() : () -> ()
    %82 = vector.shape_cast %81 : vector<1x8x8xf32> to vector<8x8xf32>
    %83 = vector.extract_strided_slice %18 {offsets = [24, 0], sizes = [8, 32], strides = [1, 1]} : vector<32x32xf32> to vector<8x32xf32>
    %cst_34 = arith.constant dense<0.000000e+00> : vector<8x32xf32>
    %84 = tpu.matmul %82, %83, %cst_34 {dimension_numbers = #tpu.dot_dimension_numbers<[1], [0], [0], [1], [0, 0, 1, 1], [], []>} : vector<8x8xf32>, vector<8x32xf32>, vector<8x32xf32> -> vector<8x32xf32>
    %85 = arith.addf %77, %84 : vector<8x32xf32>
    %86 = vector.broadcast %19 : vector<1x32xf32> to vector<8x32xf32>
    %87 = arith.addf %85, %86 : vector<8x32xf32>
    %c0_35 = arith.constant 0 : index
    %c128 = arith.constant 128 : index
    %88 = vector.load %arg7[%c0_35, %c128] : memref<1x608xf32, #tpu.memory_space<vmem>>, vector<1x32xf32>
    %c0_36 = arith.constant 0 : index
    %c160 = arith.constant 160 : index
    %89 = vector.load %arg7[%c0_36, %c160] : memref<1x608xf32, #tpu.memory_space<vmem>>, vector<1x32xf32>
    %90 = arith.addf %1, %87 : vector<8x32xf32>
    %cst_37 = arith.constant dense<0.000000e+00> : vector<8xf32>
    %91 = vector.multi_reduction <add>, %90, %cst_37 [1] : vector<8x32xf32> to vector<8xf32>
    %92 = vector.shape_cast %91 : vector<8xf32> to vector<8x1xf32>
    %cst_38 = arith.constant 3.200000e+01 : f32
    %93 = vector.broadcast %cst_38 : f32 to vector<8x1xf32>
    %94 = arith.divf %92, %93 : vector<8x1xf32>
    %95 = vector.broadcast %94 : vector<8x1xf32> to vector<8x32xf32>
    %96 = arith.subf %90, %95 : vector<8x32xf32>
    %97 = arith.mulf %96, %96 : vector<8x32xf32>
    %cst_39 = arith.constant dense<0.000000e+00> : vector<8xf32>
    %98 = vector.multi_reduction <add>, %97, %cst_39 [1] : vector<8x32xf32> to vector<8xf32>
    %99 = vector.shape_cast %98 : vector<8xf32> to vector<8x1xf32>
    %cst_40 = arith.constant 0.0322580636 : f32
    %100 = vector.broadcast %cst_40 : f32 to vector<8x1xf32>
    %101 = arith.mulf %99, %100 : vector<8x1xf32>
    %102 = math.sqrt %101 : vector<8x1xf32>
    %103 = vector.broadcast %88 : vector<1x32xf32> to vector<8x32xf32>
    %104 = arith.mulf %103, %96 : vector<8x32xf32>
    %cst_41 = arith.constant 9.99999997E-7 : f32
    %105 = vector.broadcast %cst_41 : f32 to vector<8x1xf32>
    %106 = arith.addf %102, %105 : vector<8x1xf32>
    %107 = vector.broadcast %106 : vector<8x1xf32> to vector<8x32xf32>
    %108 = arith.divf %104, %107 : vector<8x32xf32>
    %109 = vector.broadcast %89 : vector<1x32xf32> to vector<8x32xf32>
    %110 = arith.addf %108, %109 : vector<8x32xf32>
    %c0_42 = arith.constant 0 : index
    %c128_43 = arith.constant 128 : index
    %111 = vector.load %arg5[%c0_42, %c128_43] : memref<32x384xf32, #tpu.memory_space<vmem>>, vector<32x32xf32>
    %cst_44 = arith.constant dense<0.000000e+00> : vector<8x32xf32>
    %112 = tpu.matmul %110, %111, %cst_44 {dimension_numbers = #tpu.dot_dimension_numbers<[1], [0], [0], [1], [0, 0, 1, 1], [], []>} : vector<8x32xf32>, vector<32x32xf32>, vector<8x32xf32> -> vector<8x32xf32>
    %c0_45 = arith.constant 0 : index
    %c192 = arith.constant 192 : index
    %113 = vector.load %arg7[%c0_45, %c192] : memref<1x608xf32, #tpu.memory_space<vmem>>, vector<1x32xf32>
    %114 = vector.broadcast %113 : vector<1x32xf32> to vector<8x32xf32>
    %115 = arith.addf %112, %114 : vector<8x32xf32>
    %c0_46 = arith.constant 0 : index
    %c160_47 = arith.constant 160 : index
    %116 = vector.load %arg5[%c0_46, %c160_47] : memref<32x384xf32, #tpu.memory_space<vmem>>, vector<32x64xf32>
    %cst_48 = arith.constant dense<0.000000e+00> : vector<16x64xf32>
    %117 = tpu.matmul %3, %116, %cst_48 {dimension_numbers = #tpu.dot_dimension_numbers<[1], [0], [0], [1], [0, 0, 1, 1], [], []>} : vector<16x32xf32>, vector<32x64xf32>, vector<16x64xf32> -> vector<16x64xf32>
    %c0_49 = arith.constant 0 : index
    %c224 = arith.constant 224 : index
    %118 = vector.load %arg7[%c0_49, %c224] : memref<1x608xf32, #tpu.memory_space<vmem>>, vector<1x64xf32>
    %119 = vector.broadcast %118 : vector<1x64xf32> to vector<16x64xf32>
    %120 = arith.addf %117, %119 : vector<16x64xf32>
    %121 = vector.extract_strided_slice %120 {offsets = [0, 0], sizes = [16, 32], strides = [1, 1]} : vector<16x64xf32> to vector<16x32xf32>
    %122 = vector.extract_strided_slice %120 {offsets = [0, 32], sizes = [16, 32], strides = [1, 1]} : vector<16x64xf32> to vector<16x32xf32>
    %c0_50 = arith.constant 0 : index
    %c224_51 = arith.constant 224 : index
    %123 = vector.load %arg5[%c0_50, %c224_51] : memref<32x384xf32, #tpu.memory_space<vmem>>, vector<32x32xf32>
    %c0_52 = arith.constant 0 : index
    %c288 = arith.constant 288 : index
    %124 = vector.load %arg7[%c0_52, %c288] : memref<1x608xf32, #tpu.memory_space<vmem>>, vector<1x32xf32>
    %125 = vector.shape_cast %115 : vector<8x32xf32> to vector<1x8x32xf32>
    %126 = vector.shape_cast %121 : vector<16x32xf32> to vector<1x16x32xf32>
    %127 = vector.shape_cast %122 : vector<16x32xf32> to vector<1x16x32xf32>
    %128 = vector.extract_strided_slice %125 {offsets = [0, 0, 0], sizes = [1, 8, 8], strides = [1, 1, 1]} : vector<1x8x32xf32> to vector<1x8x8xf32>
    %129 = vector.extract_strided_slice %126 {offsets = [0, 0, 0], sizes = [1, 16, 8], strides = [1, 1, 1]} : vector<1x16x32xf32> to vector<1x16x8xf32>
    "tpu.trace_start"() <{level = 10 : i32, message = "bqd,bkd->bqk"}> : () -> ()
    %cst_53 = arith.constant dense<0.000000e+00> : vector<1x8x16xf32>
    %130 = tpu.matmul %128, %129, %cst_53 {dimension_numbers = #tpu.dot_dimension_numbers<[2], [2], [1], [1], [0, 0, 0, 1, 1, 1], [0], [0]>} : vector<1x8x8xf32>, vector<1x16x8xf32>, vector<1x8x16xf32> -> vector<1x8x16xf32>
    "tpu.trace_stop"() : () -> ()
    %131 = vector.extract_strided_slice %125 {offsets = [0, 0, 8], sizes = [1, 8, 8], strides = [1, 1, 1]} : vector<1x8x32xf32> to vector<1x8x8xf32>
    %132 = vector.extract_strided_slice %126 {offsets = [0, 0, 8], sizes = [1, 16, 8], strides = [1, 1, 1]} : vector<1x16x32xf32> to vector<1x16x8xf32>
    "tpu.trace_start"() <{level = 10 : i32, message = "bqd,bkd->bqk"}> : () -> ()
    %cst_54 = arith.constant dense<0.000000e+00> : vector<1x8x16xf32>
    %133 = tpu.matmul %131, %132, %cst_54 {dimension_numbers = #tpu.dot_dimension_numbers<[2], [2], [1], [1], [0, 0, 0, 1, 1, 1], [0], [0]>} : vector<1x8x8xf32>, vector<1x16x8xf32>, vector<1x8x16xf32> -> vector<1x8x16xf32>
    "tpu.trace_stop"() : () -> ()
    %134 = vector.extract_strided_slice %125 {offsets = [0, 0, 16], sizes = [1, 8, 8], strides = [1, 1, 1]} : vector<1x8x32xf32> to vector<1x8x8xf32>
    %135 = vector.extract_strided_slice %126 {offsets = [0, 0, 16], sizes = [1, 16, 8], strides = [1, 1, 1]} : vector<1x16x32xf32> to vector<1x16x8xf32>
    "tpu.trace_start"() <{level = 10 : i32, message = "bqd,bkd->bqk"}> : () -> ()
    %cst_55 = arith.constant dense<0.000000e+00> : vector<1x8x16xf32>
    %136 = tpu.matmul %134, %135, %cst_55 {dimension_numbers = #tpu.dot_dimension_numbers<[2], [2], [1], [1], [0, 0, 0, 1, 1, 1], [0], [0]>} : vector<1x8x8xf32>, vector<1x16x8xf32>, vector<1x8x16xf32> -> vector<1x8x16xf32>
    "tpu.trace_stop"() : () -> ()
    %137 = vector.extract_strided_slice %125 {offsets = [0, 0, 24], sizes = [1, 8, 8], strides = [1, 1, 1]} : vector<1x8x32xf32> to vector<1x8x8xf32>
    %138 = vector.extract_strided_slice %126 {offsets = [0, 0, 24], sizes = [1, 16, 8], strides = [1, 1, 1]} : vector<1x16x32xf32> to vector<1x16x8xf32>
    "tpu.trace_start"() <{level = 10 : i32, message = "bqd,bkd->bqk"}> : () -> ()
    %cst_56 = arith.constant dense<0.000000e+00> : vector<1x8x16xf32>
    %139 = tpu.matmul %137, %138, %cst_56 {dimension_numbers = #tpu.dot_dimension_numbers<[2], [2], [1], [1], [0, 0, 0, 1, 1, 1], [0], [0]>} : vector<1x8x8xf32>, vector<1x16x8xf32>, vector<1x8x16xf32> -> vector<1x8x16xf32>
    "tpu.trace_stop"() : () -> ()
    %140 = vector.shape_cast %130 : vector<1x8x16xf32> to vector<1x1x8x16xf32>
    %141 = vector.shape_cast %133 : vector<1x8x16xf32> to vector<1x1x8x16xf32>
    %142 = vector.shape_cast %136 : vector<1x8x16xf32> to vector<1x1x8x16xf32>
    %143 = vector.shape_cast %139 : vector<1x8x16xf32> to vector<1x1x8x16xf32>
    %144 = tpu.concatenate %140, %141, %142, %143 in 0 : vector<1x1x8x16xf32>, vector<1x1x8x16xf32>, vector<1x1x8x16xf32>, vector<1x1x8x16xf32> -> vector<4x1x8x16xf32>
    %cst_57 = arith.constant 0.353553385 : f32
    %145 = vector.broadcast %cst_57 : f32 to vector<4x1x8x16xf32>
    %146 = arith.mulf %144, %145 : vector<4x1x8x16xf32>
    %147 = vector.shape_cast %9 : vector<1x1x16xf32> to vector<1x1x1x16xf32>
    %148 = vector.broadcast %147 : vector<1x1x1x16xf32> to vector<4x1x8x16xf32>
    %149 = arith.addf %146, %148 : vector<4x1x8x16xf32>
    %cst_58 = arith.constant dense<0xFF800000> : vector<4x1x8xf32>
    %150 = vector.multi_reduction <maximumf>, %149, %cst_58 [3] : vector<4x1x8x16xf32> to vector<4x1x8xf32>
    %151 = vector.shape_cast %150 : vector<4x1x8xf32> to vector<4x1x8x1xf32>
    %152 = vector.broadcast %151 : vector<4x1x8x1xf32> to vector<4x1x8x16xf32>
    %153 = arith.subf %149, %152 : vector<4x1x8x16xf32>
    %154 = math.exp %153 : vector<4x1x8x16xf32>
    %cst_59 = arith.constant dense<0.000000e+00> : vector<4x1x8xf32>
    %155 = vector.multi_reduction <add>, %154, %cst_59 [3] : vector<4x1x8x16xf32> to vector<4x1x8xf32>
    %156 = vector.shape_cast %155 : vector<4x1x8xf32> to vector<4x1x8x1xf32>
    %157 = tpu.reciprocal %156 {approx = true} : vector<4x1x8x1xf32> -> vector<4x1x8x1xf32>
    %158 = vector.broadcast %157 : vector<4x1x8x1xf32> to vector<4x1x8x16xf32>
    %159 = arith.mulf %154, %158 : vector<4x1x8x16xf32>
    %160 = vector.extract_strided_slice %159 {offsets = [0, 0, 0, 0], sizes = [1, 1, 8, 16], strides = [1, 1, 1, 1]} : vector<4x1x8x16xf32> to vector<1x1x8x16xf32>
    %161 = vector.shape_cast %160 : vector<1x1x8x16xf32> to vector<1x8x16xf32>
    %162 = vector.extract_strided_slice %127 {offsets = [0, 0, 0], sizes = [1, 16, 8], strides = [1, 1, 1]} : vector<1x16x32xf32> to vector<1x16x8xf32>
    "tpu.trace_start"() <{level = 10 : i32, message = "bqk,bkd->bqd"}> : () -> ()
    %cst_60 = arith.constant dense<0.000000e+00> : vector<1x8x8xf32>
    %163 = tpu.matmul %161, %162, %cst_60 {dimension_numbers = #tpu.dot_dimension_numbers<[2], [1], [1], [2], [0, 0, 0, 1, 1, 2], [0], [0]>} : vector<1x8x16xf32>, vector<1x16x8xf32>, vector<1x8x8xf32> -> vector<1x8x8xf32>
    "tpu.trace_stop"() : () -> ()
    %164 = vector.shape_cast %163 : vector<1x8x8xf32> to vector<8x8xf32>
    %165 = vector.extract_strided_slice %123 {offsets = [0, 0], sizes = [8, 32], strides = [1, 1]} : vector<32x32xf32> to vector<8x32xf32>
    %cst_61 = arith.constant dense<0.000000e+00> : vector<8x32xf32>
    %166 = tpu.matmul %164, %165, %cst_61 {dimension_numbers = #tpu.dot_dimension_numbers<[1], [0], [0], [1], [0, 0, 1, 1], [], []>} : vector<8x8xf32>, vector<8x32xf32>, vector<8x32xf32> -> vector<8x32xf32>
    %167 = vector.extract_strided_slice %159 {offsets = [1, 0, 0, 0], sizes = [1, 1, 8, 16], strides = [1, 1, 1, 1]} : vector<4x1x8x16xf32> to vector<1x1x8x16xf32>
    %168 = vector.shape_cast %167 : vector<1x1x8x16xf32> to vector<1x8x16xf32>
    %169 = vector.extract_strided_slice %127 {offsets = [0, 0, 8], sizes = [1, 16, 8], strides = [1, 1, 1]} : vector<1x16x32xf32> to vector<1x16x8xf32>
    "tpu.trace_start"() <{level = 10 : i32, message = "bqk,bkd->bqd"}> : () -> ()
    %cst_62 = arith.constant dense<0.000000e+00> : vector<1x8x8xf32>
    %170 = tpu.matmul %168, %169, %cst_62 {dimension_numbers = #tpu.dot_dimension_numbers<[2], [1], [1], [2], [0, 0, 0, 1, 1, 2], [0], [0]>} : vector<1x8x16xf32>, vector<1x16x8xf32>, vector<1x8x8xf32> -> vector<1x8x8xf32>
    "tpu.trace_stop"() : () -> ()
    %171 = vector.shape_cast %170 : vector<1x8x8xf32> to vector<8x8xf32>
    %172 = vector.extract_strided_slice %123 {offsets = [8, 0], sizes = [8, 32], strides = [1, 1]} : vector<32x32xf32> to vector<8x32xf32>
    %cst_63 = arith.constant dense<0.000000e+00> : vector<8x32xf32>
    %173 = tpu.matmul %171, %172, %cst_63 {dimension_numbers = #tpu.dot_dimension_numbers<[1], [0], [0], [1], [0, 0, 1, 1], [], []>} : vector<8x8xf32>, vector<8x32xf32>, vector<8x32xf32> -> vector<8x32xf32>
    %174 = arith.addf %166, %173 : vector<8x32xf32>
    %175 = vector.extract_strided_slice %159 {offsets = [2, 0, 0, 0], sizes = [1, 1, 8, 16], strides = [1, 1, 1, 1]} : vector<4x1x8x16xf32> to vector<1x1x8x16xf32>
    %176 = vector.shape_cast %175 : vector<1x1x8x16xf32> to vector<1x8x16xf32>
    %177 = vector.extract_strided_slice %127 {offsets = [0, 0, 16], sizes = [1, 16, 8], strides = [1, 1, 1]} : vector<1x16x32xf32> to vector<1x16x8xf32>
    "tpu.trace_start"() <{level = 10 : i32, message = "bqk,bkd->bqd"}> : () -> ()
    %cst_64 = arith.constant dense<0.000000e+00> : vector<1x8x8xf32>
    %178 = tpu.matmul %176, %177, %cst_64 {dimension_numbers = #tpu.dot_dimension_numbers<[2], [1], [1], [2], [0, 0, 0, 1, 1, 2], [0], [0]>} : vector<1x8x16xf32>, vector<1x16x8xf32>, vector<1x8x8xf32> -> vector<1x8x8xf32>
    "tpu.trace_stop"() : () -> ()
    %179 = vector.shape_cast %178 : vector<1x8x8xf32> to vector<8x8xf32>
    %180 = vector.extract_strided_slice %123 {offsets = [16, 0], sizes = [8, 32], strides = [1, 1]} : vector<32x32xf32> to vector<8x32xf32>
    %cst_65 = arith.constant dense<0.000000e+00> : vector<8x32xf32>
    %181 = tpu.matmul %179, %180, %cst_65 {dimension_numbers = #tpu.dot_dimension_numbers<[1], [0], [0], [1], [0, 0, 1, 1], [], []>} : vector<8x8xf32>, vector<8x32xf32>, vector<8x32xf32> -> vector<8x32xf32>
    %182 = arith.addf %174, %181 : vector<8x32xf32>
    %183 = vector.extract_strided_slice %159 {offsets = [3, 0, 0, 0], sizes = [1, 1, 8, 16], strides = [1, 1, 1, 1]} : vector<4x1x8x16xf32> to vector<1x1x8x16xf32>
    %184 = vector.shape_cast %183 : vector<1x1x8x16xf32> to vector<1x8x16xf32>
    %185 = vector.extract_strided_slice %127 {offsets = [0, 0, 24], sizes = [1, 16, 8], strides = [1, 1, 1]} : vector<1x16x32xf32> to vector<1x16x8xf32>
    "tpu.trace_start"() <{level = 10 : i32, message = "bqk,bkd->bqd"}> : () -> ()
    %cst_66 = arith.constant dense<0.000000e+00> : vector<1x8x8xf32>
    %186 = tpu.matmul %184, %185, %cst_66 {dimension_numbers = #tpu.dot_dimension_numbers<[2], [1], [1], [2], [0, 0, 0, 1, 1, 2], [0], [0]>} : vector<1x8x16xf32>, vector<1x16x8xf32>, vector<1x8x8xf32> -> vector<1x8x8xf32>
    "tpu.trace_stop"() : () -> ()
    %187 = vector.shape_cast %186 : vector<1x8x8xf32> to vector<8x8xf32>
    %188 = vector.extract_strided_slice %123 {offsets = [24, 0], sizes = [8, 32], strides = [1, 1]} : vector<32x32xf32> to vector<8x32xf32>
    %cst_67 = arith.constant dense<0.000000e+00> : vector<8x32xf32>
    %189 = tpu.matmul %187, %188, %cst_67 {dimension_numbers = #tpu.dot_dimension_numbers<[1], [0], [0], [1], [0, 0, 1, 1], [], []>} : vector<8x8xf32>, vector<8x32xf32>, vector<8x32xf32> -> vector<8x32xf32>
    %190 = arith.addf %182, %189 : vector<8x32xf32>
    %191 = vector.broadcast %124 : vector<1x32xf32> to vector<8x32xf32>
    %192 = arith.addf %190, %191 : vector<8x32xf32>
    %193 = vector.extract_strided_slice %159 {offsets = [0, 0, 0, 0], sizes = [1, 1, 8, 16], strides = [1, 1, 1, 1]} : vector<4x1x8x16xf32> to vector<1x1x8x16xf32>
    %194 = vector.shape_cast %193 : vector<1x1x8x16xf32> to vector<1x8x16xf32>
    %195 = vector.extract_strided_slice %159 {offsets = [1, 0, 0, 0], sizes = [1, 1, 8, 16], strides = [1, 1, 1, 1]} : vector<4x1x8x16xf32> to vector<1x1x8x16xf32>
    %196 = vector.shape_cast %195 : vector<1x1x8x16xf32> to vector<1x8x16xf32>
    %197 = vector.extract_strided_slice %159 {offsets = [2, 0, 0, 0], sizes = [1, 1, 8, 16], strides = [1, 1, 1, 1]} : vector<4x1x8x16xf32> to vector<1x1x8x16xf32>
    %198 = vector.shape_cast %197 : vector<1x1x8x16xf32> to vector<1x8x16xf32>
    %199 = vector.extract_strided_slice %159 {offsets = [3, 0, 0, 0], sizes = [1, 1, 8, 16], strides = [1, 1, 1, 1]} : vector<4x1x8x16xf32> to vector<1x1x8x16xf32>
    %200 = vector.shape_cast %199 : vector<1x1x8x16xf32> to vector<1x8x16xf32>
    %201 = tpu.concatenate %194, %196, %198, %200 in 2 : vector<1x8x16xf32>, vector<1x8x16xf32>, vector<1x8x16xf32>, vector<1x8x16xf32> -> vector<1x8x64xf32>
    %c0_68 = arith.constant 0 : index
    %c0_69 = arith.constant 0 : index
    %c0_70 = arith.constant 0 : index
    %202 = vector.load %arg9[%c0_68, %c0_69, %c0_70] : memref<1x8x64xf32, #tpu.memory_space<vmem>>, vector<1x8x64xf32>
    tpu.vector_store %arg9[%c0_68, %c0_69, %c0_70], %201 {strides = array<i32>} : memref<1x8x64xf32, #tpu.memory_space<vmem>>, vector<1x8x64xf32>,
    %c0_71 = arith.constant 0 : index
    %c320 = arith.constant 320 : index
    %203 = vector.load %arg7[%c0_71, %c320] : memref<1x608xf32, #tpu.memory_space<vmem>>, vector<1x32xf32>
    %c0_72 = arith.constant 0 : index
    %c352 = arith.constant 352 : index
    %204 = vector.load %arg7[%c0_72, %c352] : memref<1x608xf32, #tpu.memory_space<vmem>>, vector<1x32xf32>
    %205 = arith.addf %110, %192 : vector<8x32xf32>
    %cst_73 = arith.constant dense<0.000000e+00> : vector<8xf32>
    %206 = vector.multi_reduction <add>, %205, %cst_73 [1] : vector<8x32xf32> to vector<8xf32>
    %207 = vector.shape_cast %206 : vector<8xf32> to vector<8x1xf32>
    %cst_74 = arith.constant 3.200000e+01 : f32
    %208 = vector.broadcast %cst_74 : f32 to vector<8x1xf32>
    %209 = arith.divf %207, %208 : vector<8x1xf32>
    %210 = vector.broadcast %209 : vector<8x1xf32> to vector<8x32xf32>
    %211 = arith.subf %205, %210 : vector<8x32xf32>
    %212 = arith.mulf %211, %211 : vector<8x32xf32>
    %cst_75 = arith.constant dense<0.000000e+00> : vector<8xf32>
    %213 = vector.multi_reduction <add>, %212, %cst_75 [1] : vector<8x32xf32> to vector<8xf32>
    %214 = vector.shape_cast %213 : vector<8xf32> to vector<8x1xf32>
    %cst_76 = arith.constant 0.0322580636 : f32
    %215 = vector.broadcast %cst_76 : f32 to vector<8x1xf32>
    %216 = arith.mulf %214, %215 : vector<8x1xf32>
    %217 = math.sqrt %216 : vector<8x1xf32>
    %218 = vector.broadcast %203 : vector<1x32xf32> to vector<8x32xf32>
    %219 = arith.mulf %218, %211 : vector<8x32xf32>
    %cst_77 = arith.constant 9.99999997E-7 : f32
    %220 = vector.broadcast %cst_77 : f32 to vector<8x1xf32>
    %221 = arith.addf %217, %220 : vector<8x1xf32>
    %222 = vector.broadcast %221 : vector<8x1xf32> to vector<8x32xf32>
    %223 = arith.divf %219, %222 : vector<8x32xf32>
    %224 = vector.broadcast %204 : vector<1x32xf32> to vector<8x32xf32>
    %225 = arith.addf %223, %224 : vector<8x32xf32>
    %c0_78 = arith.constant 0 : index
    %c256 = arith.constant 256 : index
    %226 = vector.load %arg5[%c0_78, %c256] : memref<32x384xf32, #tpu.memory_space<vmem>>, vector<32x128xf32>
    %cst_79 = arith.constant dense<0.000000e+00> : vector<8x128xf32>
    %227 = tpu.matmul %225, %226, %cst_79 {dimension_numbers = #tpu.dot_dimension_numbers<[1], [0], [0], [1], [0, 0, 1, 1], [], []>} : vector<8x32xf32>, vector<32x128xf32>, vector<8x128xf32> -> vector<8x128xf32>
    %c0_80 = arith.constant 0 : index
    %c384 = arith.constant 384 : index
    %228 = vector.load %arg7[%c0_80, %c384] : memref<1x608xf32, #tpu.memory_space<vmem>>, vector<1x128xf32>
    %229 = vector.broadcast %228 : vector<1x128xf32> to vector<8x128xf32>
    %230 = arith.addf %227, %229 : vector<8x128xf32>
    %cst_81 = arith.constant 0.000000e+00 : f32
    %231 = vector.broadcast %cst_81 : f32 to vector<8x128xf32>
    %232 = arith.maximumf %230, %231 : vector<8x128xf32>
    %c0_82 = arith.constant 0 : index
    %c0_83 = arith.constant 0 : index
    %233 = vector.load %arg6[%c0_82, %c0_83] : memref<128x32xf32, #tpu.memory_space<vmem>>, vector<128x32xf32>
    %cst_84 = arith.constant dense<0.000000e+00> : vector<8x32xf32>
    %234 = tpu.matmul %232, %233, %cst_84 {dimension_numbers = #tpu.dot_dimension_numbers<[1], [0], [0], [1], [0, 0, 1, 1], [], []>} : vector<8x128xf32>, vector<128x32xf32>, vector<8x32xf32> -> vector<8x32xf32>
    %c0_85 = arith.constant 0 : index
    %c512 = arith.constant 512 : index
    %235 = vector.load %arg7[%c0_85, %c512] : memref<1x608xf32, #tpu.memory_space<vmem>>, vector<1x32xf32>
    %236 = vector.broadcast %235 : vector<1x32xf32> to vector<8x32xf32>
    %237 = arith.addf %234, %236 : vector<8x32xf32>
    %c0_86 = arith.constant 0 : index
    %c544 = arith.constant 544 : index
    %238 = vector.load %arg7[%c0_86, %c544] : memref<1x608xf32, #tpu.memory_space<vmem>>, vector<1x32xf32>
    %c0_87 = arith.constant 0 : index
    %c576 = arith.constant 576 : index
    %239 = vector.load %arg7[%c0_87, %c576] : memref<1x608xf32, #tpu.memory_space<vmem>>, vector<1x32xf32>
    %240 = arith.addf %225, %237 : vector<8x32xf32>
    %cst_88 = arith.constant dense<0.000000e+00> : vector<8xf32>
    %241 = vector.multi_reduction <add>, %240, %cst_88 [1] : vector<8x32xf32> to vector<8xf32>
    %242 = vector.shape_cast %241 : vector<8xf32> to vector<8x1xf32>
    %cst_89 = arith.constant 3.200000e+01 : f32
    %243 = vector.broadcast %cst_89 : f32 to vector<8x1xf32>
    %244 = arith.divf %242, %243 : vector<8x1xf32>
    %245 = vector.broadcast %244 : vector<8x1xf32> to vector<8x32xf32>
    %246 = arith.subf %240, %245 : vector<8x32xf32>
    %247 = arith.mulf %246, %246 : vector<8x32xf32>
    %cst_90 = arith.constant dense<0.000000e+00> : vector<8xf32>
    %248 = vector.multi_reduction <add>, %247, %cst_90 [1] : vector<8x32xf32> to vector<8xf32>
    %249 = vector.shape_cast %248 : vector<8xf32> to vector<8x1xf32>
    %cst_91 = arith.constant 0.0322580636 : f32
    %250 = vector.broadcast %cst_91 : f32 to vector<8x1xf32>
    %251 = arith.mulf %249, %250 : vector<8x1xf32>
    %252 = math.sqrt %251 : vector<8x1xf32>
    %253 = vector.broadcast %238 : vector<1x32xf32> to vector<8x32xf32>
    %254 = arith.mulf %253, %246 : vector<8x32xf32>
    %cst_92 = arith.constant 9.99999997E-7 : f32
    %255 = vector.broadcast %cst_92 : f32 to vector<8x1xf32>
    %256 = arith.addf %252, %255 : vector<8x1xf32>
    %257 = vector.broadcast %256 : vector<8x1xf32> to vector<8x32xf32>
    %258 = arith.divf %254, %257 : vector<8x32xf32>
    %259 = vector.broadcast %239 : vector<1x32xf32> to vector<8x32xf32>
    %260 = arith.addf %258, %259 : vector<8x32xf32>
    %261 = vector.shape_cast %260 : vector<8x32xf32> to vector<1x8x32xf32>
    %c0_93 = arith.constant 0 : index
    %c0_94 = arith.constant 0 : index
    %c0_95 = arith.constant 0 : index
    %262 = vector.load %arg8[%c0_93, %c0_94, %c0_95] : memref<1x8x32xf32, #tpu.memory_space<vmem>>, vector<1x8x32xf32>
    tpu.vector_store %arg8[%c0_93, %c0_94, %c0_95], %261 {strides = array<i32>} : memref<1x8x32xf32, #tpu.memory_space<vmem>>, vector<1x8x32xf32>,
    return
  }
  func.func @transform_0(%arg0: i32) -> (i32, i32, i32) {
    %c0_i32 = arith.constant 0 : i32
    %c0_i32_0 = arith.constant 0 : i32
    %c0_i32_1 = arith.constant 0 : i32
    return %arg0, %c0_i32, %c0_i32_0 : i32, i32, i32
  }
  func.func @transform_1(%arg0: i32) -> (i32, i32, i32) {
    %c0_i32 = arith.constant 0 : i32
    %c0_i32_0 = arith.constant 0 : i32
    %c0_i32_1 = arith.constant 0 : i32
    return %arg0, %c0_i32, %c0_i32_0 : i32, i32, i32
  }
  func.func @transform_2(%arg0: i32) -> (i32, i32, i32) {
    %c0_i32 = arith.constant 0 : i32
    %c0_i32_0 = arith.constant 0 : i32
    %c0_i32_1 = arith.constant 0 : i32
    return %arg0, %c0_i32, %c0_i32_0 : i32, i32, i32
  }
  func.func @transform_3(%arg0: i32) -> (i32, i32, i32) {
    %c0_i32 = arith.constant 0 : i32
    %c0_i32_0 = arith.constant 0 : i32
    %c0_i32_1 = arith.constant 0 : i32
    return %arg0, %c0_i32, %c0_i32_0 : i32, i32, i32
  }
  func.func @transform_4(%arg0: i32) -> (i32, i32) {
    %c0_i32 = arith.constant 0 : i32
    %c0_i32_0 = arith.constant 0 : i32
    %c0_i32_1 = arith.constant 0 : i32
    return %c0_i32, %c0_i32_0 : i32, i32
  }
  func.func @transform_5(%arg0: i32) -> (i32, i32) {
    %c0_i32 = arith.constant 0 : i32
    %c0_i32_0 = arith.constant 0 : i32
    %c0_i32_1 = arith.constant 0 : i32
    return %c0_i32, %c0_i32_0 : i32, i32
  }
  func.func @transform_6(%arg0: i32) -> (i32, i32) {
    %c0_i32 = arith.constant 0 : i32
    %c0_i32_0 = arith.constant 0 : i32
    %c0_i32_1 = arith.constant 0 : i32
    return %c0_i32, %c0_i32_0 : i32, i32
  }
  func.func @transform_7(%arg0: i32) -> (i32, i32, i32) {
    %c0_i32 = arith.constant 0 : i32
    %c0_i32_0 = arith.constant 0 : i32
    %c0_i32_1 = arith.constant 0 : i32
    return %arg0, %c0_i32, %c0_i32_0 : i32, i32, i32
  }
  func.func @transform_8(%arg0: i32) -> (i32, i32, i32) {
    %c0_i32 = arith.constant 0 : i32
    %c0_i32_0 = arith.constant 0 : i32
    %c0_i32_1 = arith.constant 0 : i32
    return %arg0, %c0_i32, %c0_i32_0 : i32, i32, i32
  }
}

</mosaic_0001>

<bundles_post_ra>
// kernel: sga_forward.1
= control target key start
LH: loop header
LB: loop body
LE: loop exit
PB: predicated region body
PF: predicated region fallthrough
CT: control target
= control target key end

     0   :  { %14 = vsyncpa [#allocation3], 0  ;;  %s4258_s0 = inlined_call_operand.vmem [shape: f32[2,8,32], index: 0, kind: input, shape index: {}]   ;;  %s4259_s1 = inlined_call_operand.vmem [shape: f32[2,16,32], index: 1, kind: input, shape index: {}]   ;;  %s4260_s2 = inlined_call_operand.vmem [shape: f32[2,1,8], index: 2, kind: input, shape index: {}]   ;;  %s4261_s3 = inlined_call_operand.vmem [shape: f32[2,1,16], index: 3, kind: input, shape index: {}]   ;;  %s4262_s4 = inlined_call_operand.vmem [shape: f32[32,384], index: 4, kind: input, shape index: {}]   ;;  %s4263_s5 = inlined_call_operand.vmem [shape: f32[128,32], index: 5, kind: input, shape index: {}]   ;;  %s4264_s6 = inlined_call_operand.vmem [shape: f32[1,608], index: 6, kind: input, shape index: {}]   ;;  %s4265_s7 = inlined_call_operand.hbm [shape: f32[2,8,32], index: 7, kind: output, shape index: {0}]   ;;  %s4266_s8 = inlined_call_operand.vmem [shape: f32[2,8,64], index: 8, kind: output, shape index: {1}]  }
   0x1   :  { %16 = vsyncpa [#allocation3 + $0x1], 0  ;;  %s3687_s27 = smov 0   ;;  %s3689_s28 = smov 0  }
   0x2   :  { %s3691_s29 = smov 0   ;;  %s3693_s30 = smov 0  }
   0x3 LB: > { %s3708_s9 = sadd.s32 4294967295, %s3624_s30   ;;  %s3096_s10 = sadd.s32 4294967294, %s3624_s30   ;;  %s3624_s30 = sphi %s3693_s30, %s4285_s30   ;;  %s3620_s29 = sphi %s3691_s29, %s4284_s29   ;;  %s3616_s28 = sphi %s3689_s28, %s4283_s28   ;;  %s3612_s27 = sphi %s3687_s27, %s4282_s27  }
   0x4   : > { %s3712_s11 = sadd.s32 1, %s3624_s30   ;;  %s196_s12 = sadd.s32 1, %s3620_s29 }
   0x5   : > { %s193_s13 = ssub.s32 %s3624_s30, %s3712_s11  ;;  %p206_p0 = scmp.ne.s32.totalorder %s3620_s29, %s3616_s28 }
   0x6   : > { %p194_p1 = scmp.eq.s32.totalorder %s193_s13, 0  ;;  %p207_p2 = scmp.eq.s32.totalorder %s3708_s9, 1 }
   0x7   : > { %p212_p3 = scmp.ne.s32.totalorder %s3616_s28, %s3612_s27  ;;  %p213_p4 = scmp.eq.s32.totalorder %s3096_s10, 1 }
   0x8   : > { %s3723_s14 = scalar_select %p194_p1, %s3620_s29, %s196_s12  }
   0x9   : > { %p3725_p5 = por %p207_p2, %p206_p0  ;;  %p3729_p6 = por %p213_p4, %p212_p3 }
   0xa   : > { %p3099_p7 = scmp.ge.s32.totalorder %s3624_s30, 1  ;;  %p293_p8 = scmp.lt.s32.totalorder %s3624_s30, 3 }
   0xc   : > { %p294_p9 = pnand %p3099_p7, %p293_p8 }
   0xd   : > { %p341_p10 = scmp.lt.s32.totalorder (!%p294_p9), %s3708_s9, 1  ;;  %s3628_s19 = smov (!%p294_p9), 96  }
   0xe   : > { %297 = sbr.rel (%p294_p9) target bundleno = 4838 (0x12e6), region = 48  ;;  %s4273_s20 = smov (!%p294_p9), 88  }
   0xf   : > { %s4271_s22 = smov (!%p294_p9), 80   ;;  %s3631_s23 = smov (!%p294_p9), 120  }
  0x10   : > { %s4269_s25 = smov (!%p294_p9), 72   ;;  %s3633_s26 = smov (!%p294_p9), 112  }
  0x11   : > { %s3634_s10 = smov (!%p294_p9), 104   ;;  %s3635_s18 = smov (!%p294_p9), 56  }
  0x12   : > { %s3636_s12 = smov (!%p294_p9), 64  }
  0x13   : > { %v3738_v0 = vld [vmem:[%s4262_s4 + $0x48] sm:$0xff]  ;;  %v3626_v1 = vmov 0.0   ;;  %v3745_v2 = vld [vmem:[%s4262_s4 + $0x30] sm:$0xff]  ;;  %vm3627_vm0 = vmmov 0   ;;  %s3751_s21 = scalar_select %p341_p10, %s3708_s9, 1  ;;  %v3758_v3 = vld [vmem:[%s4262_s4 + $0x18] sm:$0xff]  ;;  %v769_v17 = vlaneseq }
  0x14   : > { %3251 = vmatprep.subr.mxu0 %v3626_v1  ;;  %3259 = vmatprep.mubr.msk.f32.mxu0 %vm3627_vm0, %v3626_v1  ;;  %v3768_v4 = vld [vmem:[%s4262_s4] sm:$0xff]  ;;  %vm378_vm1 = vcmask 261120   ;;  %vm455_vm2 = vcmask 64512   ;;  %vm2007_vm5 = vcmask 130048   ;;  %vm2694_vm8 = vcmask 392192  }
  0x15   : > { %3252 = vmatpush3.msra.mxu0 %v3738_v0  ;;  %3267 = vmatprep.subr.mxu1 %v3626_v1  ;;  %s4267_s24 = sshll.u32 %s3751_s21, 3  ;;  %v3788_v6 = vld [vmem:[%s4264_s6] ss:$0 sm:$0xff]  ;;  %s352_s17 = scalar_lea.vmem %s4260_s2, %s3751_s21  ;;  %v3832_v18 = vshrl.u32 %v769_v17, 7  ;;  %vm2696_vm9 = vcmask 523264  }
  0x16   : > { %3253 = vmatprep.subr.mxu0 %v3626_v1  ;;  %3269 = vmatprep.mubr.msk.f32.mxu1 %vm3627_vm0, %v3626_v1  ;;  %s344_s13 = scalar_lea.vmem %s4258_s0, %s4267_s24  ;;  %v363_v19 = vld [vmem:[%s352_s17] sm:$0x1]  ;;  %s3638_s17 = smov 32  }
  0x17   : > { %3254 = vmatpush3.msra.mxu0 %v3745_v2  ;;  %v3776_v5 = vld [vmem:[%s344_s13] sm:$0xff]  ;;  %v364_v20 = vmul.f32 -1e+09, %v363_v19  ;;  %v3835_v21 = vsub.s32 0, %v3832_v18  ;;  %s4268_s13 = smov 48   ;;  %s3639_s24 = smov 40  }
  0x18   : > { %3255 = vmatprep.subr.mxu0 %v3626_v1 }
  0x19   : > { %3256 = vmatpush3.msra.mxu0 %v3758_v3  ;;  %v772_v23 = vrot.slane %v364_v20, %v3835_v21 }
  0x1a   : > { %3257 = vmatprep.subr.mxu0 %v3626_v1 }
  0x1b   : > { %3258 = vmatpush3.msra.mxu0 %v3768_v4 }
  0x1c   : > { %3260 = vmatmul.mubr.msk.f32.vlgmr.msra.gmra.mxu0 %vm378_vm1, %v3776_v5  ;;  %3262 = vmatprep.subr.mxu0 %v3626_v1 }
  0x1d   : > { %3264 = vmatprep.mubr.msk.f32.mxu0 %vm3627_vm0, %v3626_v1 }
  0xdc   : > { %v448_v7 = vpop.f32.mrf.mxu0 }
  0xdd   : > { %v3791_v8 = vadd.f32 %v3788_v6, %v448_v7 }
  0xde   : > { %v3261_v9 = vpop.f32.mrf.mxu0 }
  0xdf   : > { %453 = vrot.lane.b32.xlu1 %v3791_v8, %s3628_s19  ;;  %532 = vrot.lane.b32.xlu0 %v3791_v8, %s4273_s20  ;;  %s4277_s20 = smov 88  }
  0xe3   : > { %610 = vrot.lane.b32.xlu1 %v3791_v8, %s4271_s22  ;;  %530 = vrot.lane.b32.xlu0 %v3791_v8, %s3631_s23  ;;  %s4278_s22 = smov 80  }
  0xe7   : > { %688 = vrot.lane.b32.xlu1 %v3791_v8, %s4269_s25  ;;  %608 = vrot.lane.b32.xlu0 %v3791_v8, %s3633_s26  ;;  %s3640_s25 = smov 16  }
  0xeb   : > { %686 = vrot.lane.b32.xlu0 %v3791_v8, %s3634_s10 }
 0x151   : > { %v454_v10 = vpop.permute.xlu1 %453  ;;  %v533_v11 = vpop.permute.xlu0 %532 }
 0x152   : > { %3263 = vmatpush3.xpose.msk.msra.mxu0 %vm455_vm2, %v454_v10  ;;  %3268 = vmatpush3.xpose.msk.msra.mxu1 %vm455_vm2, %v533_v11 }
 0x153   : > { %3272 = vmatprep.subr.mxu0 %v3626_v1  ;;  %3277 = vmatprep.subr.mxu1 %v3626_v1 }
 0x155   : > { %3265 = vmatmul.mubr.msk.f32.vlgmr.msra.gmra.mxu0 %vm455_vm2, %v3791_v8  ;;  %v611_v12 = vpop.permute.xlu1 %610  ;;  %v531_v13 = vpop.permute.xlu0 %530 }
 0x156   : > { %3270 = vmatmul.mubr.msk.f32.vlgmr.msra.gmra.mxu1 %vm455_vm2, %v531_v13  ;;  %3273 = vmatpush3.xpose.msk.msra.mxu0 %vm455_vm2, %v611_v12 }
 0x157   : > { %3274 = vmatprep.mubr.msk.f32.mxu0 %vm3627_vm0, %v3626_v1  ;;  %3279 = vmatprep.mubr.msk.f32.mxu1 %vm3627_vm0, %v3626_v1 }
 0x158   : > { %3282 = vmatprep.subr.mxu0 %v3626_v1 }
 0x159   : > { %v689_v14 = vpop.permute.xlu1 %688  ;;  %v609_v15 = vpop.permute.xlu0 %608 }
 0x15a   : > { %3275 = vmatmul.mubr.msk.f32.vlgmr.msra.gmra.mxu0 %vm455_vm2, %v609_v15  ;;  %3278 = vmatpush3.xpose.msk.msra.mxu1 %vm455_vm2, %v689_v14 }
 0x15b   : > { %3287 = vmatprep.subr.mxu1 %v3626_v1  ;;  %3284 = vmatprep.mubr.msk.f32.mxu0 %vm3627_vm0, %v3626_v1 }
 0x15d   : > { %v687_v16 = vpop.permute.xlu0 %686 }
 0x15e   : > { %3280 = vmatmul.mubr.msk.f32.vlgmr.msra.gmra.mxu1 %vm455_vm2, %v687_v16 }
 0x15f   : > { %3289 = vmatprep.mubr.msk.f32.mxu1 %vm3627_vm0, %v3626_v1 }
 0x215   : > { %v526_v22 = vpop.f32.mrf.mxu0 }
 0x216   : > { %v604_v24 = vpop.f32.mrf.mxu1  ;;  %v764_v25 = vmul.f32 0.35355338, %v526_v22 }
 0x217   : > { %v765_v26 = vmul.f32 0.35355338, %v604_v24  ;;  %v3266_v27 = vpop.f32.mrf.mxu0 }
 0x218   : > { %v3271_v28 = vpop.f32.mrf.mxu1  ;;  %v774_v33 = vadd.f32 %v772_v23, %v764_v25 }
 0x219   : > { %v775_v29 = vadd.f32 %v772_v23, %v765_v26 }
 0x21a   : > { %v682_v30 = vpop.f32.mrf.mxu0  ;;  %v778_v37 = vsel %vm455_vm2, %v774_v33, -inf }
 0x21b   : > { %v766_v31 = vmul.f32 0.35355338, %v682_v30  ;;  %v781_v32 = vsel %vm455_vm2, %v775_v29, -inf }
 0x21c   : > { %782 = vmax.xlane.f32.xlu1 %v781_v32  ;;  %v3276_v34 = vpop.f32.mrf.mxu0 }
 0x21d   : > { %v776_v38 = vadd.f32 %v772_v23, %v766_v31 }
 0x21e   : > { %v760_v35 = vpop.f32.mrf.mxu1 }
 0x21f   : > { %v767_v36 = vmul.f32 0.35355338, %v760_v35  ;;  %v784_v40 = vsel %vm455_vm2, %v776_v38, -inf }
 0x220   : > { %v3281_v39 = vpop.f32.mrf.mxu1  ;;  %779 = vmax.xlane.f32.xlu1 %v778_v37 }
 0x221   : > { %v777_v41 = vadd.f32 %v772_v23, %v767_v36 }
 0x223   : > { %v787_v42 = vsel %vm455_vm2, %v777_v41, -inf }
 0x224   : > { %785 = vmax.xlane.f32.xlu1 %v784_v40 }
 0x228   : > { %788 = vmax.xlane.f32.xlu1 %v787_v42 }
 0x2a5   : > { %v783_v43 = vpop.xlane.xlu1 %782 }
 0x2a6   : > { %v791_v44 = vsub.f32 %v775_v29, %v783_v43 }
 0x2a8   : > { %v796_v45 = vmul.f32 1.442695, %v791_v44 }
 0x2a9   : > { %v780_v46 = vpop.xlane.xlu1 %779 }
 0x2aa   : > { %3520 = vpow2.f32 %v796_v45  ;;  %v790_v47 = vsub.f32 %v774_v33, %v780_v46  ;;  %v3903_v46 = vld [vmem:[%s4262_s4 + $0x50] sm:$0xff] }
 0x2ac   : > { %v794_v48 = vmul.f32 1.442695, %v790_v47  ;;  %v3123_v47 = vld [vmem:[%s4264_s6 + $0x1] ss:$0 sm:$0xff] }
 0x2ad   : > { %v786_v49 = vpop.xlane.xlu1 %785 }
 0x2ae   : > { %3522 = vpow2.f32 %v794_v48  ;;  %v792_v50 = vsub.f32 %v776_v38, %v786_v49  ;;  %v3922_v48 = vld [vmem:[%s4262_s4 + $0x20] sm:$0xff]  ;;  %v3929_v49 = vld [vmem:[%s4262_s4 + $0x8] sm:$0xff] }
 0x2b0   : > { %v798_v51 = vmul.f32 1.442695, %v792_v50 }
 0x2b1   : > { %v789_v52 = vpop.xlane.xlu1 %788 }
 0x2b2   : > { %3524 = vpow2.f32 %v798_v51  ;;  %v793_v53 = vsub.f32 %v777_v41, %v789_v52 }
 0x2b4   : > { %v800_v54 = vmul.f32 1.442695, %v793_v53 }
 0x2b6   : > { %3526 = vpow2.f32 %v800_v54 }
 0x2b7   : > { %v3521_v55 = vpop.eup %3520 }
 0x2b8   : > { %v805_v56 = vsel %vm455_vm2, %v3521_v55, 0.0 }
 0x2b9   : > { %806 = vadd.xlane.f32.xlu0 %v805_v56  ;;  %v1562_v56 = vsub.s32 1, %v3832_v18 }
 0x2bb   : > { %v3523_v57 = vpop.eup %3522 }
 0x2bc   : > { %v802_v58 = vsel %vm455_vm2, %v3523_v57, 0.0 }
 0x2bd   : > { %803 = vadd.xlane.f32.xlu1 %v802_v58 }
 0x2bf   : > { %v3525_v59 = vpop.eup %3524 }
 0x2c0   : > { %v808_v60 = vsel %vm455_vm2, %v3525_v59, 0.0 }
 0x2c1   : > { %809 = vadd.xlane.f32.xlu1 %v808_v60 }
 0x2c3   : > { %v3845_v61 = vpop.eup %3526 }
 0x2c4   : > { %v811_v62 = vsel %vm455_vm2, %v3845_v61, 0.0 }
 0x2c5   : > { %812 = vadd.xlane.f32.xlu1 %v811_v62 }
 0x2cf   : > { %898 = vrot.lane.b32.xlu0 %v3791_v8, %s3635_s18 }
 0x2d3   : > { %822 = vrot.lane.b32.xlu0 %v3791_v8, %s3636_s12 }
 0x2d6   : > { %975 = vrot.lane.b32.xlu1 %v3758_v3, %s3638_s17 }
 0x2d7   : > { %1128 = vrot.lane.b32.xlu0 %v3791_v8, %s4268_s13 }
 0x2da   : > { %1436 = vrot.lane.b32.xlu1 %v3788_v6, %s3638_s17 }
 0x2db   : > { %1282 = vrot.lane.b32.xlu0 %v3791_v8, %s3639_s24  ;;  %s3156_s24 = sshll.u32 %s3751_s21, 4 }
 0x2dc   : > { %s349_s13 = scalar_lea.vmem %s4259_s1, %s3156_s24  ;;  %s4279_s24 = smov 72  }
 0x2df   : > { %1052 = vrot.lane.b32.xlu0 %v3768_v4, %s3638_s17 }
 0x2e3   : > { %1205 = vrot.lane.b32.xlu0 %v3745_v2, %s3638_s17 }
 0x2e7   : > { %1359 = vrot.lane.b32.xlu0 %v3738_v0, %s3638_s17 }
 0x342   : > { %v807_v63 = vpop.xlane.xlu0 %806 }
 0x343   : > { %3528 = vrcp.f32 %v807_v63 }
 0x346   : > { %v899_v7 = vpop.permute.xlu0 %898  ;;  %v804_v9 = vpop.xlane.xlu1 %803 }
 0x347   : > { %3530 = vrcp.f32 %v804_v9  ;;  %3288 = vmatpush3.msra.mxu1 %v899_v7 }
 0x348   : > { %3297 = vmatprep.subr.mxu1 %v3626_v1 }
 0x34a   : > { %v823_v3 = vpop.permute.xlu0 %822  ;;  %v810_v8 = vpop.xlane.xlu1 %809 }
 0x34b   : > { %3283 = vmatpush3.msra.mxu0 %v823_v3  ;;  %3532 = vrcp.f32 %v810_v8 }
 0x34c   : > { %3292 = vmatprep.subr.mxu0 %v3626_v1 }
 0x34e   : > { %v813_v6 = vpop.xlane.xlu1 %812  ;;  %v1129_v12 = vpop.permute.xlu0 %1128 }
 0x34f   : > { %3534 = vrcp.f32 %v813_v6 }
 0x350   : > { %v3529_v4 = vpop.eup %3528 }
 0x351   : > { %v819_v10 = vmul.f32 %v3529_v4, %v3521_v55  ;;  %v1554_v55 = vld [vmem:[%s4264_s6 + $0x1] sm:$0x3] }
 0x352   : > { %v976_v11 = vpop.permute.xlu1 %975  ;;  %v1283_v13 = vpop.permute.xlu0 %1282  ;;  %v1563_v58 = vrot.slane %v1554_v55, %v1562_v56 }
 0x353   : > { %3290 = vmatmul.mubr.msk.f32.vlgmr.msra.gmra.mxu1 %vm455_vm2, %v819_v10 }
 0x354   : > { %v3531_v2 = vpop.eup %3530  ;;  %3299 = vmatprep.mubr.msk.f32.mxu1 %vm3627_vm0, %v3626_v1 }
 0x355   : > { %v818_v0 = vmul.f32 %v3531_v2, %v3523_v57  ;;  %v1559_v57 = vrot.slane %v1554_v55, %v3835_v21 }
 0x356   : > { %v1053_v14 = vpop.permute.xlu0 %1052  ;;  %v1437_v40 = vpop.permute.xlu1 %1436 }
 0x357   : > { %3285 = vmatmul.mubr.msk.f32.vlgmr.msra.gmra.mxu0 %vm455_vm2, %v818_v0  ;;  %3298 = vmatpush3.msra.mxu1 %v1053_v14  ;;  %v362_v14 = vld [vmem:[%s349_s13 + $0x8] sm:$0xff] }
 0x358   : > { %3293 = vmatpush3.msra.mxu0 %v976_v11  ;;  %3294 = vmatprep.mubr.msk.f32.mxu0 %vm3627_vm0, %v3626_v1  ;;  %v3533_v15 = vpop.eup %3532  ;;  %v361_v11 = vld [vmem:[%s349_s13] sm:$0xff]  ;;  %s4280_s13 = smov 48  }
 0x359   : > { %3302 = vmatprep.subr.mxu0 %v3626_v1  ;;  %3307 = vmatprep.subr.mxu1 %v3626_v1  ;;  %v820_v19 = vmul.f32 %v3533_v15, %v3525_v59 }
 0x35a   : > { %v1206_v23 = vpop.permute.xlu0 %1205 }
 0x35c   : > { %v3535_v20 = vpop.eup %3534 }
 0x35d   : > { %v821_v25 = vmul.f32 %v3535_v20, %v3845_v61 }
 0x35e   : > { %v1360_v28 = vpop.permute.xlu0 %1359 }
 0x413   : > { %v970_v16 = vpop.f32.mrf.mxu1 }
 0x414   : > { %3295 = vmatmul.mubr.msk.f32.vlgmr.msra.gmra.mxu0 %vm455_vm2, %v970_v16 }
 0x415   : > { %3303 = vmatpush3.msra.mxu0 %v1129_v12  ;;  %v3291_v17 = vpop.f32.mrf.mxu1  ;;  %3304 = vmatprep.mubr.msk.f32.mxu0 %vm3627_vm0, %v3626_v1 }
 0x416   : > { %3312 = vmatprep.subr.mxu0 %v3626_v1 }
 0x417   : > { %v894_v22 = vpop.f32.mrf.mxu0 }
 0x418   : > { %3300 = vmatmul.mubr.msk.f32.vlgmr.msra.gmra.mxu1 %vm455_vm2, %v894_v22  ;;  %3305 = vmatmul.mubr.msk.f32.vlgmr.msra.gmra.mxu0 %vm455_vm2, %v820_v19 }
 0x419   : > { %3313 = vmatpush3.msra.mxu0 %v1283_v13  ;;  %v3286_v24 = vpop.f32.mrf.mxu0  ;;  %3314 = vmatprep.mubr.msk.f32.mxu0 %vm3627_vm0, %v3626_v1 }
 0x41a   : > { %3308 = vmatpush3.msra.mxu1 %v1206_v23  ;;  %3309 = vmatprep.mubr.msk.f32.mxu1 %vm3627_vm0, %v3626_v1 }
 0x41b   : > { %3317 = vmatprep.subr.mxu1 %v3626_v1  ;;  %3322 = vmatprep.subr.mxu0 %v3626_v1 }
 0x41c   : > { %3315 = vmatmul.mubr.msk.f32.vlgmr.msra.gmra.mxu0 %vm455_vm2, %v821_v25 }
 0x41d   : > { %3330 = vmatprep.mubr.msk.f32.mxu0 %vm3627_vm0, %v3626_v1  ;;  %3323 = vmatpush3.msra.mxu0 %v3903_v46 }
 0x41e   : > { %3324 = vmatprep.subr.mxu0 %v3626_v1 }
 0x4d4   : > { %v1047_v26 = vpop.f32.mrf.mxu0 }
 0x4d6   : > { %v3296_v27 = vpop.f32.mrf.mxu0 }
 0x4d8   : > { %v1124_v29 = vpop.f32.mrf.mxu1  ;;  %v1200_v30 = vpop.f32.mrf.mxu0 }
 0x4d9   : > { %v1125_v31 = vadd.f32 %v1124_v29, %v1047_v26  ;;  %3310 = vmatmul.mubr.msk.f32.vlgmr.msra.gmra.mxu1 %vm455_vm2, %v1200_v30 }
 0x4da   : > { %3318 = vmatpush3.msra.mxu1 %v1360_v28  ;;  %v3301_v32 = vpop.f32.mrf.mxu1  ;;  %v3306_v33 = vpop.f32.mrf.mxu0  ;;  %3319 = vmatprep.mubr.msk.f32.mxu1 %vm3627_vm0, %v3626_v1 }
 0x4db   : > { %3351 = vmatprep.subr.mxu1 %v3626_v1 }
 0x4dc   : > { %v1354_v34 = vpop.f32.mrf.mxu0 }
 0x4dd   : > { %3320 = vmatmul.mubr.msk.f32.vlgmr.msra.gmra.mxu1 %vm455_vm2, %v1354_v34 }
 0x4de   : > { %v3316_v35 = vpop.f32.mrf.mxu0  ;;  %3355 = vmatprep.mubr.msk.f32.mxu1 %vm3627_vm0, %v3626_v1 }
 0x599   : > { %v1277_v36 = vpop.f32.mrf.mxu1 }
 0x59a   : > { %v1281_v38 = vadd.f32 %v1277_v36, %v1125_v31 }
 0x59b   : > { %v3311_v37 = vpop.f32.mrf.mxu1 }
 0x59d   : > { %v1431_v39 = vpop.f32.mrf.mxu1 }
 0x59e   : > { %v1435_v41 = vadd.f32 %v1431_v39, %v1281_v38 }
 0x59f   : > { %v3321_v42 = vpop.f32.mrf.mxu1 }
 0x5a0   : > { %v1439_v43 = vadd.f32 %v1437_v40, %v1435_v41 }
 0x5a2   : > { %v1441_v44 = vadd.f32 %v1439_v43, %v3776_v5  ;;  %v3914_v5 = vld [vmem:[%s4262_s4 + $0x38] sm:$0xff] }
 0x5a3   : > { %3325 = vmatpush3.msra.mxu0 %v3914_v5 }
 0x5a4   : > { %v1442_v45 = vsel %vm378_vm1, %v1441_v44, 0.0  ;;  %3326 = vmatprep.subr.mxu0 %v3626_v1 }
 0x5a5   : > { %1443 = vadd.xlane.f32.xlu0 %v1442_v45  ;;  %3327 = vmatpush3.msra.mxu0 %v3922_v48 }
 0x5a6   : > { %3328 = vmatprep.subr.mxu0 %v3626_v1 }
 0x5a7   : > { %3329 = vmatpush3.msra.mxu0 %v3929_v49 }
 0x5bb   : > { %1470 = vrot.lane.b32.xlu0 %v3123_v47, %s3628_s19 }
 0x5bf   : > { %1572 = vrot.lane.b32.xlu0 %v3914_v5, %s3628_s19 }
 0x5c3   : > { %1568 = vrot.lane.b32.xlu0 %v3929_v49, %s3628_s19 }
 0x5c7   : > { %1582 = vrot.lane.b32.xlu0 %v1563_v58, %s3638_s17 }
 0x62e   : > { %v1444_v50 = vpop.xlane.xlu0 %1443 }
 0x62f   : > { %v1446_v51 = vmul.f32 0.03125, %v1444_v50 }
 0x631   : > { %v1447_v52 = vsub.f32 %v1441_v44, %v1446_v51 }
 0x632   : > { %v1471_v8 = vpop.permute.xlu0 %1470 }
 0x633   : > { %v1448_v53 = vmul.f32 %v1447_v52, %v1447_v52  ;;  %v1466_v4 = vmul.f32 %v3123_v47, %v1447_v52 }
 0x635   : > { %v1449_v54 = vsel %vm378_vm1, %v1448_v53, 0.0 }
 0x636   : > { %1450 = vadd.xlane.f32.xlu1 %v1449_v54  ;;  %v1573_v2 = vpop.permute.xlu0 %1572 }
 0x63a   : > { %v1569_v13 = vpop.permute.xlu0 %1568 }
 0x63e   : > { %v1583_v17 = vpop.permute.xlu0 %1582 }
 0x647   : > { %1574 = vrot.lane.b32.xlu1 %v3903_v46, %s3628_s19 }
 0x64b   : > { %1570 = vrot.lane.b32.xlu1 %v3922_v48, %s3628_s19 }
 0x64f   : > { %1580 = vrot.lane.b32.xlu1 %v1559_v57, %s3638_s17 }
 0x653   : > { %1478 = vrot.lane.b32.xlu1 %v3123_v47, %s3636_s12 }
 0x6bf   : > { %v1451_v59 = vpop.xlane.xlu1 %1450 }
 0x6c0   : > { %v1452_v60 = vmul.f32 0.032258064, %v1451_v59 }
 0x6c2   : > { %3536 = vrsqrt.f32 %v1452_v60  ;;  %vm1455_vm3 = vcmp.eq.f32.partialorder %v1452_v60, inf  ;;  %v1458_v7 = vand.u32 2147483648, %v1452_v60  ;;  %vm1457_vm4 = vcmp.eq.f32.partialorder %v1452_v60, 0.0 }
 0x6c3   : > { %v1575_v61 = vpop.permute.xlu1 %1574 }
 0x6c4   : > { %3333 = vmatprep.subr.mxu0 %v1575_v61 }
 0x6c7   : > { %v1571_v12 = vpop.permute.xlu1 %1570 }
 0x6cb   : > { %v1581_v19 = vpop.permute.xlu1 %1580 }
 0x6cc   : > { %v1584_v20 = vsel %vm378_vm1, %v1581_v19, %v1583_v17 }
 0x6cf   : > { %v3537_v62 = vpop.eup %3536  ;;  %v1479_v24 = vpop.permute.xlu1 %1478 }
 0x6d0   : > { %v1454_v63 = vmul.f32 %v3537_v62, %v1452_v60 }
 0x6d2   : > { %v1456_v18 = vsel %vm1455_vm3, %v1452_v60, %v1454_v63 }
 0x6d3   : > { %v1459_v9 = vsel %vm1457_vm4, %v1458_v7, %v1456_v18 }
 0x6d4   : > { %v1467_v3 = vadd.f32 1e-06, %v1459_v9 }
 0x6d6   : > { %3538 = vrcp.f32 %v1467_v3 }
 0x6e3   : > { %v3539_v6 = vpop.eup %3538 }
 0x6e4   : > { %v1469_v10 = vmul.f32 %v3539_v6, %v1466_v4 }
 0x6e6   : > { %v3952_v0 = vadd.f32 %v1471_v8, %v1469_v10 }
 0x6e8   : > { %3331 = vmatmul.mubr.msk.f32.vlgmr.msra.gmra.mxu0 %vm378_vm1, %v3952_v0 }
 0x6e9   : > { %3334 = vmatpush3.msra.mxu0 %v1575_v61  ;;  %3341 = vmatprep.mubr.msk.f32.mxu0 %vm378_vm1, %v361_v11 }
 0x6ea   : > { %3335 = vmatprep.subr.mxu0 %v1573_v2 }
 0x6eb   : > { %3336 = vmatpush3.msra.mxu0 %v1573_v2 }
 0x6ec   : > { %3337 = vmatprep.subr.mxu0 %v1571_v12 }
 0x6ed   : > { %3338 = vmatpush3.msra.mxu0 %v1571_v12 }
 0x6ee   : > { %3339 = vmatprep.subr.mxu0 %v1569_v13 }
 0x6ef   : > { %3340 = vmatpush3.msra.mxu0 %v1569_v13 }
 0x6f0   : > { %3342 = vmatmul.mubr.msk.f32.vlgmr.msra.gmra.mxu0 %vm378_vm1, %v362_v14  ;;  %3344 = vmatprep.subr.mxu0 %v3626_v1 }
 0x6f1   : > { %3348 = vmatprep.mubr.msk.f32.mxu0 %vm3627_vm0, %v3626_v1 }
 0x7a8   : > { %v1550_v15 = vpop.f32.mrf.mxu0 }
 0x7a9   : > { %v1551_v27 = vadd.f32 %v1550_v15, %v1479_v24 }
 0x7aa   : > { %v3332_v16 = vpop.f32.mrf.mxu0 }
 0x7b0   : > { %v3343_v22 = vpop.f32.mrf.mxu0 }
 0x7b1   : > { %v3962_v23 = vadd.f32 %v3343_v22, %v1584_v20 }
 0x7b2   : > { %v1658_v25 = vpop.f32.mrf.mxu0 }
 0x7b3   : > { %v3964_v26 = vadd.f32 %v1658_v25, %v1584_v20  ;;  %1751 = vrot.lane.b32.xlu0 %v3962_v23, %s3631_s23  ;;  %3345 = vmatpush3.xpose.msk.msra.mxu0 %vm455_vm2, %v3962_v23 }
 0x7b4   : > { %3346 = vmatprep.subr.mxu0 %v3626_v1 }
 0x7b5   : > { %1749 = vrot.lane.b32.xlu1 %v3964_v26, %s3631_s23 }
 0x7b7   : > { %1747 = vrot.lane.b32.xlu0 %v1551_v27, %s3631_s23  ;;  %3347 = vmatpush3.xpose.msk.msra.mxu0 %vm455_vm2, %v3964_v26 }
 0x7b8   : > { %3358 = vmatprep.subr.mxu0 %v3626_v1 }
 0x7b9   : > { %1833 = vrot.lane.b32.xlu1 %v3962_v23, %s3633_s26 }
 0x7ba   : > { %3349 = vmatmul.mubr.msk.f32.vlgmr.msra.gmra.mxu0 %vm455_vm2, %v1551_v27 }
 0x7bb   : > { %1831 = vrot.lane.b32.xlu0 %v3964_v26, %s3633_s26  ;;  %3362 = vmatprep.mubr.msk.f32.mxu0 %vm3627_vm0, %v3626_v1 }
 0x7bd   : > { %1915 = vrot.lane.b32.xlu1 %v3962_v23, %s3634_s10 }
 0x7bf   : > { %1829 = vrot.lane.b32.xlu0 %v1551_v27, %s3633_s26 }
 0x7c1   : > { %1913 = vrot.lane.b32.xlu1 %v3964_v26, %s3634_s10 }
 0x7c3   : > { %1911 = vrot.lane.b32.xlu0 %v1551_v27, %s3634_s10  ;;  %s355_s10 = scalar_lea.vmem %s4261_s3, %s3751_s21 }
 0x7c4   : > { %v365_v39 = vld [vmem:[%s355_s10] sm:$0x1] }
 0x7c5   : > { %v366_v40 = vmul.f32 -1e+09, %v365_v39 }
 0x7c7   : > { %v2001_v43 = vrot.slane %v366_v40, %v3835_v21 }
 0x825   : > { %v1752_v28 = vpop.permute.xlu0 %1751 }
 0x826   : > { %3352 = vmatpush3.xpose.msk.msra.mxu1 %vm455_vm2, %v1752_v28 }
 0x827   : > { %v1750_v29 = vpop.permute.xlu1 %1749  ;;  %3353 = vmatprep.subr.mxu1 %v3626_v1 }
 0x829   : > { %v1748_v30 = vpop.permute.xlu0 %1747 }
 0x82a   : > { %3354 = vmatpush3.xpose.msk.msra.mxu1 %vm455_vm2, %v1750_v29 }
 0x82b   : > { %v1834_v31 = vpop.permute.xlu1 %1833  ;;  %3365 = vmatprep.subr.mxu1 %v3626_v1 }
 0x82c   : > { %3359 = vmatpush3.xpose.msk.msra.mxu0 %vm455_vm2, %v1834_v31 }
 0x82d   : > { %v1832_v32 = vpop.permute.xlu0 %1831  ;;  %3356 = vmatmul.mubr.msk.f32.vlgmr.msra.gmra.mxu1 %vm455_vm2, %v1748_v30  ;;  %3360 = vmatprep.subr.mxu0 %v3626_v1 }
 0x82e   : > { %3369 = vmatprep.mubr.msk.f32.mxu1 %vm3627_vm0, %v3626_v1 }
 0x82f   : > { %v1916_v33 = vpop.permute.xlu1 %1915 }
 0x830   : > { %3361 = vmatpush3.xpose.msk.msra.mxu0 %vm455_vm2, %v1832_v32  ;;  %3366 = vmatpush3.xpose.msk.msra.mxu1 %vm455_vm2, %v1916_v33 }
 0x831   : > { %v1830_v34 = vpop.permute.xlu0 %1829  ;;  %3367 = vmatprep.subr.mxu1 %v3626_v1  ;;  %3372 = vmatprep.subr.mxu0 %v3626_v1 }
 0x833   : > { %v1914_v35 = vpop.permute.xlu1 %1913  ;;  %3363 = vmatmul.mubr.msk.f32.vlgmr.msra.gmra.mxu0 %vm455_vm2, %v1830_v34 }
 0x834   : > { %3368 = vmatpush3.xpose.msk.msra.mxu1 %vm455_vm2, %v1914_v35  ;;  %3376 = vmatprep.mubr.msk.f32.mxu0 %vm3627_vm0, %v3626_v1 }
 0x835   : > { %v1912_v36 = vpop.permute.xlu0 %1911  ;;  %3379 = vmatprep.subr.mxu1 %v3626_v1 }
 0x837   : > { %3370 = vmatmul.mubr.msk.f32.vlgmr.msra.gmra.mxu1 %vm455_vm2, %v1912_v36 }
 0x838   : > { %3383 = vmatprep.mubr.msk.f32.mxu1 %vm3627_vm0, %v3626_v1 }
 0x87a   : > { %v1743_v37 = vpop.f32.mrf.mxu0 }
 0x87b   : > { %v1993_v54 = vmul.f32 0.35355338, %v1743_v37 }
 0x87c   : > { %v3350_v38 = vpop.f32.mrf.mxu0 }
 0x87d   : > { %v2003_v55 = vadd.f32 %v2001_v43, %v1993_v54 }
 0x87f   : > { %v2008_v56 = vsel %vm2007_vm5, %v2003_v55, -inf }
 0x8ed   : > { %v1825_v41 = vpop.f32.mrf.mxu1 }
 0x8ee   : > { %v1994_v42 = vmul.f32 0.35355338, %v1825_v41 }
 0x8ef   : > { %v3357_v44 = vpop.f32.mrf.mxu1 }
 0x8f0   : > { %v2004_v45 = vadd.f32 %v2001_v43, %v1994_v42 }
 0x8f2   : > { %v2011_v47 = vsel %vm2007_vm5, %v2004_v45, -inf }
 0x8f3   : > { %2012 = vmax.xlane.f32.xlu1 %v2011_v47  ;;  %v1907_v50 = vpop.f32.mrf.mxu0 }
 0x8f4   : > { %v1995_v18 = vmul.f32 0.35355338, %v1907_v50 }
 0x8f5   : > { %v3364_v51 = vpop.f32.mrf.mxu0 }
 0x8f6   : > { %v2005_v3 = vadd.f32 %v2001_v43, %v1995_v18 }
 0x8f7   : > { %v1989_v52 = vpop.f32.mrf.mxu1 }
 0x8f8   : > { %v1996_v9 = vmul.f32 0.35355338, %v1989_v52  ;;  %v2014_v6 = vsel %vm2007_vm5, %v2005_v3, -inf }
 0x8f9   : > { %v3371_v53 = vpop.f32.mrf.mxu1 }
 0x8fa   : > { %v2006_v10 = vadd.f32 %v2001_v43, %v1996_v9 }
 0x8fc   : > { %v2017_v2 = vsel %vm2007_vm5, %v2006_v10, -inf }
 0x904   : > { %2131 = vrot.lane.b32.xlu1 %v3964_v26, %s4277_s20 }
 0x928   : > { %2009 = vmax.xlane.f32.xlu1 %v2008_v56 }
 0x97c   : > { %v2013_v57 = vpop.xlane.xlu1 %2012 }
 0x97d   : > { %v2021_v21 = vsub.f32 %v2004_v45, %v2013_v57  ;;  %v4092_v45 = vld [vmem:[%s4264_s6 + $0x2] ss:$0 sm:$0xff] }
 0x97f   : > { %v2026_v58 = vmul.f32 1.442695, %v2021_v21 }
 0x980   : > { %v2132_v61 = vpop.permute.xlu1 %2131 }
 0x981   : > { %3540 = vpow2.f32 %v2026_v58 }
 0x98e   : > { %v3541_v59 = vpop.eup %3540 }
 0x98f   : > { %v2035_v60 = vsel %vm2007_vm5, %v3541_v59, 0.0 }
 0x990   : > { %2036 = vadd.xlane.f32.xlu0 %v2035_v60 }
 0x9a6   : > { %2133 = vrot.lane.b32.xlu0 %v3962_v23, %s4277_s20  ;;  %s3153_s20 = sshll.u32 %s3708_s9, 7 }
 0x9b1   : > { %v2010_v62 = vpop.xlane.xlu1 %2009 }
 0x9b2   : > { %v2020_v63 = vsub.f32 %v2003_v55, %v2010_v62 }
 0x9b4   : > { %v2024_v7 = vmul.f32 1.442695, %v2020_v63 }
 0x9b6   : > { %3542 = vpow2.f32 %v2024_v7 }
 0x9c3   : > { %v3543_v8 = vpop.eup %3542 }
 0x9c4   : > { %v2032_v4 = vsel %vm2007_vm5, %v3543_v8, 0.0 }
 0x9c5   : > { %2033 = vadd.xlane.f32.xlu1 %v2032_v4  ;;  %2015 = vmax.xlane.f32.xlu0 %v2014_v6 }
 0x9c9   : > { %2018 = vmax.xlane.f32.xlu0 %v2017_v2 }
 0x9d6   : > { %2052 = vrot.lane.b32.xlu1 %v3964_v26, %s3628_s19 }
 0x9da   : > { %2210 = vrot.lane.b32.xlu1 %v3922_v48, %s3638_s17 }
 0x9de   : > { %2362 = vrot.lane.b32.xlu1 %v3964_v26, %s4278_s22 }
 0x9df   : > { %2054 = vrot.lane.b32.xlu0 %v3962_v23, %s3628_s19 }
 0x9e3   : > { %2364 = vrot.lane.b32.xlu0 %v3962_v23, %s4278_s22 }
 0xa19   : > { %v2037_v11 = vpop.xlane.xlu0 %2036 }
 0xa1a   : > { %3544 = vrcp.f32 %v2037_v11  ;;  %v2738_v11 = vld [vmem:[%s4262_s4 + $0x58] sm:$0xff] }
 0xa1d   : > { %v2134_v12 = vpop.permute.xlu0 %2133 }
 0xa1e   : > { %3380 = vmatpush3.msra.mxu1 %v2134_v12  ;;  %v2736_v12 = vld [vmem:[%s4262_s4 + $0x28] sm:$0xff] }
 0xa1f   : > { %3381 = vmatprep.subr.mxu1 %v3626_v1 }
 0xa20   : > { %3382 = vmatpush3.msra.mxu1 %v2132_v61 }
 0xa21   : > { %3391 = vmatprep.subr.mxu1 %v3626_v1 }
 0xa27   : > { %v3545_v13 = vpop.eup %3544 }
 0xa28   : > { %v4038_v48 = vmul.f32 %v3545_v13, %v3541_v59  ;;  %v2735_v13 = vld [vmem:[%s4262_s4 + $0x10] sm:$0xff] }
 0xa2a   : > { %3384 = vmatmul.mubr.msk.f32.vlgmr.msra.gmra.mxu1 %vm2007_vm5, %v4038_v48 }
 0xa2b   : > { %3393 = vmatprep.mubr.msk.f32.mxu1 %vm3627_vm0, %v3626_v1 }
 0xa4e   : > { %v2034_v14 = vpop.xlane.xlu1 %2033  ;;  %v2016_v15 = vpop.xlane.xlu0 %2015 }
 0xa4f   : > { %3546 = vrcp.f32 %v2034_v14  ;;  %v2022_v16 = vsub.f32 %v2005_v3, %v2016_v15 }
 0xa51   : > { %v2028_v17 = vmul.f32 1.442695, %v2022_v16 }
 0xa52   : > { %v2019_v19 = vpop.xlane.xlu0 %2018  ;;  %v2053_v25 = vpop.permute.xlu1 %2052 }
 0xa53   : > { %3548 = vpow2.f32 %v2028_v17  ;;  %v2023_v20 = vsub.f32 %v2006_v10, %v2019_v19 }
 0xa55   : > { %v2030_v22 = vmul.f32 1.442695, %v2023_v20 }
 0xa56   : > { %v2055_v24 = vpop.permute.xlu0 %2054  ;;  %v2211_v29 = vpop.permute.xlu1 %2210 }
 0xa57   : > { %3550 = vpow2.f32 %v2030_v22  ;;  %3373 = vmatpush3.msra.mxu0 %v2055_v24 }
 0xa58   : > { %3374 = vmatprep.subr.mxu0 %v3626_v1 }
 0xa59   : > { %3375 = vmatpush3.msra.mxu0 %v2053_v25  ;;  %v2837_v25 = vld [vmem:[%s4263_s5 + $0x78] sm:$0xff] }
 0xa5a   : > { %3386 = vmatprep.subr.mxu0 %v3626_v1  ;;  %v2365_v34 = vpop.permute.xlu0 %2364  ;;  %v2363_v36 = vpop.permute.xlu1 %2362 }
 0xa5c   : > { %v3547_v27 = vpop.eup %3546 }
 0xa5d   : > { %v4046_v28 = vmul.f32 %v3547_v27, %v3543_v8  ;;  %v2836_v27 = vld [vmem:[%s4263_s5 + $0x70] sm:$0xff] }
 0xa5f   : > { %3377 = vmatmul.mubr.msk.f32.vlgmr.msra.gmra.mxu0 %vm2007_vm5, %v4046_v28 }
 0xa60   : > { %v3549_v30 = vpop.eup %3548  ;;  %3387 = vmatpush3.msra.mxu0 %v2211_v29  ;;  %3388 = vmatprep.mubr.msk.f32.mxu0 %vm3627_vm0, %v3626_v1  ;;  %v2835_v29 = vld [vmem:[%s4263_s5 + $0x68] sm:$0xff] }
 0xa61   : > { %v2038_v31 = vsel %vm2007_vm5, %v3549_v30, 0.0  ;;  %3396 = vmatprep.subr.mxu0 %v3626_v1 }
 0xa62   : > { %2039 = vadd.xlane.f32.xlu0 %v2038_v31  ;;  %v2834_v31 = vld [vmem:[%s4263_s5 + $0x60] sm:$0xff] }
 0xa64   : > { %v3551_v32 = vpop.eup %3550 }
 0xa65   : > { %v2041_v33 = vsel %vm2007_vm5, %v3551_v32, 0.0 }
 0xa66   : > { %2042 = vadd.xlane.f32.xlu1 %v2041_v33 }
 0xa77   : > { %2518 = vrot.lane.b32.xlu1 %v3964_v26, %s4279_s24 }
 0xa78   : > { %2520 = vrot.lane.b32.xlu0 %v3962_v23, %s4279_s24 }
 0xa7b   : > { %2441 = vrot.lane.b32.xlu1 %v3914_v5, %s3638_s17 }
 0xa7c   : > { %2286 = vrot.lane.b32.xlu0 %v3929_v49, %s3638_s17 }
 0xa7f   : > { %2679 = vrot.lane.b32.xlu1 %v4092_v45, %s3628_s19 }
 0xa80   : > { %2597 = vrot.lane.b32.xlu0 %v3903_v46, %s3638_s17 }
 0xaea   : > { %v2206_v35 = vpop.f32.mrf.mxu1 }
 0xaeb   : > { %3389 = vmatmul.mubr.msk.f32.vlgmr.msra.gmra.mxu0 %vm455_vm2, %v2206_v35  ;;  %v2040_v37 = vpop.xlane.xlu0 %2039 }
 0xaec   : > { %3397 = vmatpush3.msra.mxu0 %v2365_v34  ;;  %3552 = vrcp.f32 %v2040_v37  ;;  %v3385_v26 = vpop.f32.mrf.mxu1  ;;  %3400 = vmatprep.mubr.msk.f32.mxu0 %vm3627_vm0, %v3626_v1 }
 0xaed   : > { %3398 = vmatprep.subr.mxu0 %v3626_v1  ;;  %v2831_v26 = vld [vmem:[%s4263_s5 + $0x48] sm:$0xff] }
 0xaee   : > { %3399 = vmatpush3.msra.mxu0 %v2363_v36  ;;  %v2832_v36 = vld [vmem:[%s4263_s5 + $0x50] sm:$0xff] }
 0xaef   : > { %v2043_v5 = vpop.xlane.xlu1 %2042  ;;  %v2521_v49 = vpop.permute.xlu0 %2520  ;;  %3408 = vmatprep.subr.mxu0 %v3626_v1 }
 0xaf0   : > { %3554 = vrcp.f32 %v2043_v5 }
 0xaf3   : > { %v2287_v46 = vpop.permute.xlu0 %2286  ;;  %v2519_v40 = vpop.permute.xlu1 %2518 }
 0xaf4   : > { %3392 = vmatpush3.msra.mxu1 %v2287_v46  ;;  %v2829_v46 = vld [vmem:[%s4263_s5 + $0x38] sm:$0xff] }
 0xaf5   : > { %3403 = vmatprep.subr.mxu1 %v3626_v1 }
 0xaf7   : > { %v2442_v44 = vpop.permute.xlu1 %2441  ;;  %v2598_v51 = vpop.permute.xlu0 %2597 }
 0xaf9   : > { %v3553_v23 = vpop.eup %3552 }
 0xafa   : > { %v4071_v38 = vmul.f32 %v3553_v23, %v3549_v30  ;;  %v2828_v23 = vld [vmem:[%s4263_s5 + $0x30] sm:$0xff] }
 0xafb   : > { %v2680_v62 = vpop.permute.xlu1 %2679 }
 0xafc   : > { %3401 = vmatmul.mubr.msk.f32.vlgmr.msra.gmra.mxu0 %vm2007_vm5, %v4071_v38 }
 0xafd   : > { %v3555_v39 = vpop.eup %3554  ;;  %3409 = vmatpush3.msra.mxu0 %v2521_v49  ;;  %3412 = vmatprep.mubr.msk.f32.mxu0 %vm3627_vm0, %v3626_v1  ;;  %v2830_v49 = vld [vmem:[%s4263_s5 + $0x40] sm:$0xff] }
 0xafe   : > { %3410 = vmatprep.subr.mxu0 %v3626_v1  ;;  %v4078_v41 = vmul.f32 %v3555_v39, %v3551_v32  ;;  %v2833_v32 = vld [vmem:[%s4263_s5 + $0x58] sm:$0xff]  ;;  %v2827_v39 = vld [vmem:[%s4263_s5 + $0x28] sm:$0xff] }
 0xaff   : > { %3411 = vmatpush3.msra.mxu0 %v2519_v40  ;;  %v2826_v40 = vld [vmem:[%s4263_s5 + $0x20] sm:$0xff] }
 0xb00   : > { %3413 = vmatmul.mubr.msk.f32.vlgmr.msra.gmra.mxu0 %vm2007_vm5, %v4078_v41  ;;  %3420 = vmatprep.subr.mxu0 %v3626_v1 }
 0xb01   : > { %3428 = vmatprep.mubr.msk.f32.mxu0 %vm3627_vm0, %v3626_v1  ;;  %3421 = vmatpush3.msra.mxu0 %v2738_v11 }
 0xb02   : > { %3422 = vmatprep.subr.mxu0 %v3626_v1 }
 0xb1f   : > { %v2127_v42 = vpop.f32.mrf.mxu0 }
 0xb20   : > { %3394 = vmatmul.mubr.msk.f32.vlgmr.msra.gmra.mxu1 %vm455_vm2, %v2127_v42  ;;  %v2825_v42 = vld [vmem:[%s4263_s5 + $0x18] sm:$0xff] }
 0xb21   : > { %v3378_v43 = vpop.f32.mrf.mxu0  ;;  %3405 = vmatprep.mubr.msk.f32.mxu1 %vm3627_vm0, %v3626_v1  ;;  %3404 = vmatpush3.msra.mxu1 %v2442_v44  ;;  %v2824_v44 = vld [vmem:[%s4263_s5 + $0x10] sm:$0xff] }
 0xb22   : > { %3415 = vmatprep.subr.mxu1 %v3626_v1 }
 0xbab   : > { %v2282_v47 = vpop.f32.mrf.mxu0 }
 0xbad   : > { %v3390_v50 = vpop.f32.mrf.mxu0 }
 0xbae   : > { %v3149_v50 = vld [vmem:[%s4264_s6 + $0x3] ss:$0 sm:$0xff] }
 0xbbc   : > { %v2437_v52 = vpop.f32.mrf.mxu0 }
 0xbbd   : > { %3406 = vmatmul.mubr.msk.f32.vlgmr.msra.gmra.mxu1 %vm455_vm2, %v2437_v52 }
 0xbbe   : > { %3416 = vmatpush3.msra.mxu1 %v2598_v51  ;;  %v3402_v53 = vpop.f32.mrf.mxu0  ;;  %3417 = vmatprep.mubr.msk.f32.mxu1 %vm3627_vm0, %v3626_v1 }
 0xbbf   : > { %3431 = vmatprep.subr.mxu1 %v3626_v1 }
 0xbc0   : > { %v2593_v54 = vpop.f32.mrf.mxu0 }
 0xbc1   : > { %3418 = vmatmul.mubr.msk.f32.vlgmr.msra.gmra.mxu1 %vm455_vm2, %v2593_v54 }
 0xbc2   : > { %v3414_v55 = vpop.f32.mrf.mxu0  ;;  %3463 = vmatprep.mubr.msk.f32.mxu1 %vm3627_vm0, %v3626_v1  ;;  %3432 = vmatpush3.msra.mxu1 %v2837_v25 }
 0xbc3   : > { %3433 = vmatprep.subr.mxu1 %v3626_v1  ;;  %v3151_v55 = vld [vmem:[%s4264_s6 + $0x4] ss:$0 sm:$0xff] }
 0xbc4   : > { %3434 = vmatpush3.msra.mxu1 %v2836_v27 }
 0xbc5   : > { %3435 = vmatprep.subr.mxu1 %v3626_v1 }
 0xbc6   : > { %3436 = vmatpush3.msra.mxu1 %v2835_v29 }
 0xbc7   : > { %3437 = vmatprep.subr.mxu1 %v3626_v1 }
 0xbc8   : > { %3438 = vmatpush3.msra.mxu1 %v2834_v31 }
 0xbc9   : > { %3439 = vmatprep.subr.mxu1 %v3626_v1 }
 0xbca   : > { %3440 = vmatpush3.msra.mxu1 %v2833_v32 }
 0xbcb   : > { %3441 = vmatprep.subr.mxu1 %v3626_v1 }
 0xbcc   : > { %3442 = vmatpush3.msra.mxu1 %v2832_v36 }
 0xbcd   : > { %3443 = vmatprep.subr.mxu1 %v3626_v1 }
 0xbce   : > { %3444 = vmatpush3.msra.mxu1 %v2831_v26 }
 0xbcf   : > { %3445 = vmatprep.subr.mxu1 %v3626_v1 }
 0xbd0   : > { %3446 = vmatpush3.msra.mxu1 %v2830_v49 }
 0xbd1   : > { %3447 = vmatprep.subr.mxu1 %v3626_v1 }
 0xbd2   : > { %3448 = vmatpush3.msra.mxu1 %v2829_v46 }
 0xbd3   : > { %3449 = vmatprep.subr.mxu1 %v3626_v1 }
 0xbd4   : > { %3450 = vmatpush3.msra.mxu1 %v2828_v23 }
 0xbd5   : > { %3451 = vmatprep.subr.mxu1 %v3626_v1 }
 0xbd6   : > { %3452 = vmatpush3.msra.mxu1 %v2827_v39 }
 0xbd7   : > { %3453 = vmatprep.subr.mxu1 %v3626_v1 }
 0xbd8   : > { %3454 = vmatpush3.msra.mxu1 %v2826_v40 }
 0xbd9   : > { %3455 = vmatprep.subr.mxu1 %v3626_v1 }
 0xbda   : > { %3456 = vmatpush3.msra.mxu1 %v2825_v42 }
 0xbdb   : > { %3457 = vmatprep.subr.mxu1 %v3626_v1 }
 0xbdc   : > { %3458 = vmatpush3.msra.mxu1 %v2824_v44 }
 0xbdd   : > { %3459 = vmatprep.subr.mxu1 %v3626_v1 }
 0xbe0   : > { %v2358_v56 = vpop.f32.mrf.mxu1 }
 0xbe1   : > { %v2359_v57 = vadd.f32 %v2358_v56, %v2282_v47  ;;  %v2822_v47 = vld [vmem:[%s4263_s5] sm:$0xff] }
 0xbe2   : > { %v3395_v21 = vpop.f32.mrf.mxu1 }
 0xc7d   : > { %v2513_v58 = vpop.f32.mrf.mxu1 }
 0xc7e   : > { %v2517_v60 = vadd.f32 %v2513_v58, %v2359_v57 }
 0xc7f   : > { %v3407_v59 = vpop.f32.mrf.mxu1 }
 0xc81   : > { %v2669_v61 = vpop.f32.mrf.mxu1 }
 0xc82   : > { %v2673_v63 = vadd.f32 %v2669_v61, %v2517_v60 }
 0xc83   : > { %v3419_v7 = vpop.f32.mrf.mxu1 }
 0xc84   : > { %v2682_v18 = vadd.f32 %v2680_v62, %v2673_v63 }
 0xc86   : > { %v2699_v9 = vadd.f32 %v2682_v18, %v3952_v0  ;;  %v2737_v0 = vld [vmem:[%s4262_s4 + $0x40] sm:$0xff] }
 0xc87   : > { %3423 = vmatpush3.msra.mxu0 %v2737_v0 }
 0xc88   : > { %v2700_v3 = vsel %vm378_vm1, %v2699_v9, 0.0  ;;  %3424 = vmatprep.subr.mxu0 %v3626_v1 }
 0xc89   : > { %2701 = vadd.xlane.f32.xlu0 %v2700_v3  ;;  %3425 = vmatpush3.msra.mxu0 %v2736_v12 }
 0xc8a   : > { %3426 = vmatprep.subr.mxu0 %v3626_v1 }
 0xc8b   : > { %3427 = vmatpush3.msra.mxu0 %v2735_v13 }
 0xd12   : > { %v2702_v8 = vpop.xlane.xlu0 %2701 }
 0xd13   : > { %v2703_v4 = vmul.f32 0.03125, %v2702_v8 }
 0xd15   : > { %v2704_v6 = vsub.f32 %v2699_v9, %v2703_v4 }
 0xd17   : > { %2724 = vrot.lane.b32.xlu0 %v2704_v6, %s3636_s12  ;;  %v2705_v10 = vmul.f32 %v2704_v6, %v2704_v6 }
 0xd19   : > { %v2706_v2 = vsel %vm378_vm1, %v2705_v10, 0.0 }
 0xd1a   : > { %2707 = vadd.xlane.f32.xlu1 %v2706_v2 }
 0xd2b   : > { %2731 = vrot.lane.b32.xlu1 %v4092_v45, %s3628_s19 }
 0xd89   : > { %v2725_v30 = vpop.permute.xlu0 %2724 }
 0xd8a   : > { %v2727_v33 = vmul.f32 %v4092_v45, %v2725_v30  ;;  %v2823_v45 = vld [vmem:[%s4263_s5 + $0x8] sm:$0xff] }
 0xd8b   : > { %3460 = vmatpush3.msra.mxu1 %v2823_v45 }
 0xd8c   : > { %3461 = vmatprep.subr.mxu1 %v3626_v1 }
 0xd8d   : > { %3462 = vmatpush3.msra.mxu1 %v2822_v47 }
 0xda3   : > { %v2708_v14 = vpop.xlane.xlu1 %2707 }
 0xda4   : > { %v2709_v15 = vmul.f32 0.032258064, %v2708_v14 }
 0xda6   : > { %3556 = vrsqrt.f32 %v2709_v15  ;;  %vm2712_vm6 = vcmp.eq.f32.partialorder %v2709_v15, inf  ;;  %v2715_v19 = vand.u32 2147483648, %v2709_v15  ;;  %vm2714_vm7 = vcmp.eq.f32.partialorder %v2709_v15, 0.0 }
 0xda7   : > { %v2732_v35 = vpop.permute.xlu1 %2731 }
 0xdb3   : > { %v3557_v16 = vpop.eup %3556 }
 0xdb4   : > { %v2711_v17 = vmul.f32 %v3557_v16, %v2709_v15 }
 0xdb6   : > { %v2713_v20 = vsel %vm2712_vm6, %v2709_v15, %v2711_v17 }
 0xdb7   : > { %v2716_v22 = vsel %vm2714_vm7, %v2715_v19, %v2713_v20 }
 0xdb8   : > { %v2728_v24 = vadd.f32 1e-06, %v2716_v22 }
 0xdba   : > { %3558 = vrcp.f32 %v2728_v24 }
 0xdc7   : > { %v3559_v34 = vpop.eup %3558 }
 0xdc8   : > { %v2730_v37 = vmul.f32 %v3559_v34, %v2727_v33 }
 0xdca   : > { %v2734_v5 = vadd.f32 %v2732_v35, %v2730_v37 }
 0xdcc   : > { %2747 = vrot.lane.b32.xlu0 %v2734_v5, %s3636_s12 }
 0xe3e   : > { %v2748_v43 = vpop.permute.xlu0 %2747 }
 0xe3f   : > { %3429 = vmatmul.mubr.msk.f32.vlgmr.msra.gmra.mxu0 %vm378_vm1, %v2748_v43 }
 0xeff   : > { %v2817_v51 = vpop.f32.mrf.mxu0 }
 0xf00   : > { %v2818_v52 = vadd.f32 %v3149_v50, %v2817_v51 }
 0xf01   : > { %v3430_v53 = vpop.f32.mrf.mxu0 }
 0xf02   : > { %v2821_v54 = vmax.f32 %v2818_v52, 0.0 }
 0xf04   : > { %3464 = vmatmul.mubr.f32.vlgmr.msra.gmra.mxu1 %v2821_v54 }
 0xfc4   : > { %v2911_v56 = vpop.f32.mrf.mxu1 }
 0xfc5   : > { %v2912_v57 = vadd.f32 %v3151_v55, %v2911_v56 }
 0xfc6   : > { %v3465_v21 = vpop.f32.mrf.mxu1 }
 0xfc7   : > { %2916 = vrot.lane.b32.xlu1 %v2912_v57, %s3636_s12 }
0x1039   : > { %v2917_v1 = vpop.permute.xlu1 %2916 }
0x103a   : > { %v2919_v58 = vadd.f32 %v2917_v1, %v2734_v5 }
0x103c   : > { %2921 = vrot.lane.b32.xlu0 %v2919_v58, %s3636_s12 }
0x10ae   : > { %v2922_v59 = vpop.permute.xlu0 %2921 }
0x10af   : > { %v2924_v60 = vsel %vm378_vm1, %v2922_v59, 0.0 }
0x10b0   : > { %2925 = vadd.xlane.f32.xlu1 %v2924_v60 }
0x1139   : > { %v2926_v61 = vpop.xlane.xlu1 %2925 }
0x113a   : > { %v2927_v62 = vmul.f32 0.03125, %v2926_v61 }
0x113c   : > { %v2928_v63 = vsub.f32 %v2919_v58, %v2927_v62 }
0x113e   : > { %2946 = vrot.lane.b32.xlu1 %v2928_v63, %s3628_s19  ;;  %v2929_v7 = vmul.f32 %v2928_v63, %v2928_v63 }
0x1140   : > { %2931 = vrot.lane.b32.xlu0 %v2929_v7, %s3636_s12  ;;  %s4281_s12 = sshll.u32 %s3751_s21, 3  ;;  %s332_s21 = sand.u32 1, %s3616_s28  }
0x1141   : > { %s359_s26 = scalar_lea.vmem %s4266_s8, %s4281_s12  ;;  %s3100_s10 = sshll.u32 %s332_s21, 3 }
0x1142   : > { %2683 = vrot.lane.b32.xlu1 %v4038_v48, %s3640_s25  ;;  %s334_s22 = scalar_lea.vmem [#allocation2], %s3100_s10  ;;  %s2963_s12 = scalar_lea.sflag [#allocation3], %s332_s21 }
0x1143   : > { %s2980_s24 = sshll.u32 %s334_s22, 4  ;;  %s2981_s24 = int_to_ptr.vmem [resolvable:$true] %s2980_s24 }
0x1144   : > { %s3564_s23 = scalar_lea.vmem %s2981_s24, 128 }
0x1145   : > { %p3565_p11 = scmp.ne.s32.totalorder %s2981_s24, %s3564_s23 }
0x1146   : > { %2686 = vrot.lane.b32.xlu1 %v4071_v38, %s3638_s17 }
0x1147   : > { %p3566_p12 = pnand %p3565_p11, %p3725_p5 }
0x1149   : > { %p3567_p13 = pneg %p3566_p12 }
0x11b0   : > { %v2947_v3 = vpop.permute.xlu1 %2946 }
0x11b1   : > { %v2949_v17 = vmul.f32 %v3151_v55, %v2947_v3 }
0x11b2   : > { %v2932_v18 = vpop.permute.xlu0 %2931 }
0x11b3   : > { %v2934_v9 = vsel %vm378_vm1, %v2932_v18, 0.0 }
0x11b4   : > { %2935 = vadd.xlane.f32.xlu0 %v2934_v9  ;;  %v2684_v8 = vpop.permute.xlu1 %2683 }
0x11b5   : > { %v2692_v48 = vsel %vm2007_vm5, %v4046_v28, %v2684_v8 }
0x11b8   : > { %v2687_v2 = vpop.permute.xlu1 %2686 }
0x11b9   : > { %v2693_v38 = vsel %vm378_vm1, %v2692_v48, %v2687_v2 }
0x11ca   : > { %2953 = vrot.lane.b32.xlu0 %v3151_v55, %s3628_s19 }
0x11ce   : > { %2689 = vrot.lane.b32.xlu0 %v4078_v41, %s4280_s13  ;;  %s4222_s13 = scalar_lea.hbm %s4265_s7, %s3153_s20 }
0x123d   : > { %v2936_v4 = vpop.xlane.xlu0 %2935 }
0x123e   : > { %v2937_v6 = vmul.f32 0.032258064, %v2936_v4 }
0x1240   : > { %3560 = vrsqrt.f32 %v2937_v6  ;;  %vm2940_vm10 = vcmp.eq.f32.partialorder %v2937_v6, inf  ;;  %v2943_v13 = vand.u32 2147483648, %v2937_v6  ;;  %vm2942_vm11 = vcmp.eq.f32.partialorder %v2937_v6, 0.0 }
0x1241   : > { %v2954_v10 = vpop.permute.xlu0 %2953 }
0x1245   : > { %v2690_v41 = vpop.permute.xlu0 %2689 }
0x1246   : > { %v2695_v11 = vsel %vm2694_vm8, %v2693_v38, %v2690_v41 }
0x1247   : > { %2697 = vst.msk [vmem:[%s359_s26] sm:$0xff] %vm2696_vm9, %v2695_v11 }
0x124d   : > { %v3561_v0 = vpop.eup %3560 }
0x124e   : > { %v2939_v12 = vmul.f32 %v3561_v0, %v2937_v6 }
0x1250   : > { %v2941_v14 = vsel %vm2940_vm10, %v2937_v6, %v2939_v12 }
0x1251   : > { %v2944_v15 = vsel %vm2942_vm11, %v2943_v13, %v2941_v14 }
0x1252   : > { %v2950_v16 = vadd.f32 1e-06, %v2944_v15 }
0x1254   : > { %3562 = vrcp.f32 %v2950_v16 }
0x1261   : > { %v3563_v19 = vpop.eup %3562 }
0x1262   : > { %v2952_v28 = vmul.f32 %v3563_v19, %v2949_v17 }
0x1264   : > { %v2956_v20 = vadd.f32 %v2954_v10, %v2952_v28 }
0x1266   : > { %2958 = vrot.lane.b32.xlu1 %v2956_v20, %s3628_s19  ;;  %s3641_s19 = smov [#allocation2]  }
0x1267   : > { %s3568_s17 = sshll.u32 %s3641_s19, 4  ;;  %s3569_s17 = int_to_ptr.vmem [resolvable:$false] %s3568_s17 }
0x1268   : > { %s3570_s9 = scalar_lea.vmem %s3569_s17, 256  ;;  %p3571_p0 = scmp.lt.s32.totalorder %s2981_s24, %s3569_s17 }
0x1269   : > { %p3572_p1 = scmp.lt.s32.totalorder %s3570_s9, %s3564_s23 }
0x126b   : > { %p3573_p2 = por %p3572_p1, %p3571_p0 }
0x126d   : > { %p3574_p3 = pnand %p3573_p2, %p3567_p13 }
0x12d8   : > { %v2959_v22 = vpop.permute.xlu1 %2958 }
0x12d9   : > { %2961 = vst.msk [vmem:[%s334_s22] sm:$0xff] %vm378_vm1, %v2959_v22 }
0x12da   : > { %3577 = shalt.err (!%p3574_p3)
}
0x12db   : > { %s3578_s26 = scalar_lea.hbm %s4222_s13, 128  ;;  %s3582_s20 = scalar_lea.hbm %s4265_s7, 256 }
0x12dc   : > { %p3579_p4 = scmp.ne.s32.totalorder %s4222_s13, %s3578_s26  ;;  %p3583_p9 = scmp.lt.s32.totalorder %s4222_s13, %s4265_s7 }
0x12dd   : > { %p3584_p10 = scmp.lt.s32.totalorder %s3582_s20, %s3578_s26 }
0x12de   : > { %p3580_p7 = pnand %p3579_p4, %p3725_p5 }
0x12df   : > { %p3585_p11 = por %p3584_p10, %p3583_p9 }
0x12e0   : > { %p3581_p8 = pneg %p3580_p7 }
0x12e2   : > { %p3586_p12 = pnand %p3585_p11, %p3581_p8 }
0x12e4   : > { %3589 = shalt.err (!%p3586_p12)
}
0x12e5   : > { %3466 = dma.vmem_to_hbm [thread:$0]  (%p3725_p5), %s2981_s24, 128, %s4222_s13, %s2963_s12  }
0x12e6 PF: > { %p3472_p13 = scmp.ge.s32.totalorder %s3624_s30, 2  ;;  %s2995_s25 = sand.u32 1, %s3612_s27  }
0x12e7   : > { %s2996_s23 = scalar_lea.sflag [#allocation3], %s2995_s25 }
0x12e8   : > { %p3469_p0 = pnand %p3472_p13, %p3729_p6 }
0x12ea   : > { %p3470_p1 = pneg %p3469_p0 }
0x12ec   : > { %3607 = dma.done.wait (%p3470_p1), %s2996_s23, 128  }
0x12ed   : > { %3609 = vsyncadd (%p3470_p1), %s2996_s23, 4294967168  ;;  %p19_p2 = scmp.ge.s32.totalorder %s3712_s11, 4   ;;  %s4282_s27 = smov %s3616_s28 }
0x12ee   : > { %s4283_s28 = smov %s3620_s29  ;;  %s4284_s29 = smov %s3723_s14 }
0x12ef   : > { %s4285_s30 = smov %s3712_s11  ;;  %21 = sbr.rel (!%p19_p2) target bundleno = 3 (0x3), region = 104 }
0x12f4   :  { %3008 = vsyncpa [#allocation3], 1 }
0x12f5   :  { %3010 = vsyncpa [#allocation3 + $0x1], 1 }

</bundles_post_ra>
